<compile_context>
chip_gen: v7x
topology: tpu7x:2x2x1
jax: 0.10.0
libtpu: 0.0.40
codegen_flags: <defaults>
</compile_context>

<pallas_src>
import functools
import math

import jax
import jax.numpy as jnp
from jax.experimental import pallas as pl
from jax.experimental.pallas import tpu as pltpu

DTYPE = jnp.float32

# Set to jnp.bfloat16 to feed the MXU bf16 (f32 accumulation stays) for higher
# throughput at realistic sizes; kept f32 here to preserve reference numerics.
MXU_INPUT_DTYPE = jnp.float32


def _round_up(x, m):
    return (x + m - 1) // m * m


# --------------------------- Pallas kernels ---------------------------------

def _linear_kernel(x_ref, w_ref, b_ref, o_ref, acc_ref, *, activation):
    @pl.when(pl.program_id(2) == 0)
    def _init():
        acc_ref[...] = jnp.zeros_like(acc_ref)

    acc_ref[...] += jnp.dot(
        x_ref[...].astype(MXU_INPUT_DTYPE),
        w_ref[...].astype(MXU_INPUT_DTYPE),
        preferred_element_type=jnp.float32)

    @pl.when(pl.program_id(2) == pl.num_programs(2) - 1)
    def _finalize():
        y = acc_ref[...] + b_ref[...].astype(jnp.float32)
        if activation == "relu":
            y = jnp.maximum(y, 0.0)
        o_ref[...] = y.astype(o_ref.dtype)


def linear(x, w, b, activation=None):
    """(..., d_in) @ (d_in, d_out) + (1, d_out) -> (..., d_out), tiled matmul."""
    lead = x.shape[:-1]
    m = math.prod(lead) if lead else 1
    k_dim = x.shape[-1]
    n_dim = w.shape[1]

    # Tile sizes (tunable per TPU generation); padded to lane/sublane multiples.
    tm = min(256, _round_up(m, 8))
    tk = min(512, _round_up(k_dim, 128))
    tn = min(256, _round_up(n_dim, 128))
    mp, kp, np_ = _round_up(m, tm), _round_up(k_dim, tk), _round_up(n_dim, tn)

    x2 = x.reshape(m, k_dim)
    if (mp, kp) != (m, k_dim):
        x2 = jnp.pad(x2, ((0, mp - m), (0, kp - k_dim)))
    wp = w if (kp, np_) == (k_dim, n_dim) else jnp.pad(
        w, ((0, kp - k_dim), (0, np_ - n_dim)))
    bp = b if np_ == n_dim else jnp.pad(b, ((0, 0), (0, np_ - n_dim)))

    out = pl.pallas_call(
        functools.partial(_linear_kernel, activation=activation),
        out_shape=jax.ShapeDtypeStruct((mp, np_), x.dtype),
        grid_spec=pltpu.PrefetchScalarGridSpec(
            num_scalar_prefetch=0,
            grid=(mp // tm, np_ // tn, kp // tk),
            in_specs=[
                pl.BlockSpec((tm, tk), lambda i, j, k: (i, k)),
                pl.BlockSpec((tk, tn), lambda i, j, k: (k, j)),
                pl.BlockSpec((1, tn), lambda i, j, k: (0, j)),
            ],
            out_specs=pl.BlockSpec((tm, tn), lambda i, j, k: (i, j)),
            scratch_shapes=[pltpu.VMEM((tm, tn), jnp.float32)],
        ),
        compiler_params=pltpu.CompilerParams(
            dimension_semantics=("parallel", "parallel", "arbitrary")),
    )(x2, wp, bp)
    out = out[:m, :n_dim]
    return out.reshape(*lead, n_dim)


def _add_ln_kernel(x_ref, a_ref, g_ref, b_ref, o_ref, *, eps):
    x = x_ref[...].astype(jnp.float32)
    a = a_ref[...].astype(jnp.float32)
    d = a.shape[-1]
    mean = jnp.mean(a, axis=-1, keepdims=True)
    diff = a - mean
    # torch.Tensor.std default is the unbiased estimator (divide by N-1);
    # eps is added to the std (not the variance), matching the reference.
    var = jnp.sum(diff * diff, axis=-1, keepdims=True) * (1.0 / (d - 1))
    inv = pl.reciprocal(jnp.sqrt(var) + eps, approx=True)
    y = x + g_ref[...] * diff * inv + b_ref[...]
    o_ref[...] = y.astype(o_ref.dtype)


def residual_layer_norm(x, a, gamma, beta, eps=1e-6):
    """Fused residual + LayerNorm: x + gamma*(a-mean)/(std+eps)+beta."""
    lead = x.shape[:-1]
    m = math.prod(lead) if lead else 1
    d = x.shape[-1]
    tm = min(512, _round_up(m, 8))
    mp = _round_up(m, tm)

    x2 = x.reshape(m, d)
    a2 = a.reshape(m, d)
    if mp != m:
        x2 = jnp.pad(x2, ((0, mp - m), (0, 0)))
        a2 = jnp.pad(a2, ((0, mp - m), (0, 0)))

    out = pl.pallas_call(
        functools.partial(_add_ln_kernel, eps=eps),
        out_shape=jax.ShapeDtypeStruct((mp, d), x.dtype),
        grid=(mp // tm,),
        in_specs=[pl.BlockSpec((tm, d), lambda i: (i, 0)),
                  pl.BlockSpec((tm, d), lambda i: (i, 0)),
                  pl.BlockSpec((1, d), lambda i: (0, 0)),
                  pl.BlockSpec((1, d), lambda i: (0, 0))],
        out_specs=pl.BlockSpec((tm, d), lambda i: (i, 0)),
        compiler_params=pltpu.CompilerParams(dimension_semantics=("parallel",)),
    )(x2, a2, gamma, beta)
    return out[:m].reshape(x.shape)


def _mha_kernel(q_ref, k_ref, v_ref, o_ref, *, n_heads, inv_scale, causal, kv_len):
    q = q_ref[0].astype(jnp.float32)   # (Tq, D)
    k = k_ref[0].astype(jnp.float32)   # (Tkp, D)
    v = v_ref[0].astype(jnp.float32)   # (Tkp, D)
    tq, d = q.shape
    tkp = k.shape[0]
    dk = d // n_heads

    col = jax.lax.broadcasted_iota(jnp.int32, (tq, tkp), 1)
    mask = col >= kv_len                       # mask zero-padded key rows
    if causal:
        row = jax.lax.broadcasted_iota(jnp.int32, (tq, tkp), 0)
        mask = mask | (col > row)

    outs = []
    for h in range(n_heads):                   # static unrolled loop over heads
        qh = q[:, h * dk:(h + 1) * dk]
        kh = k[:, h * dk:(h + 1) * dk]
        vh = v[:, h * dk:(h + 1) * dk]
        s = jax.lax.dot_general(qh, kh, (((1,), (1,)), ((), ())),
                                preferred_element_type=jnp.float32) * inv_scale
        s = jnp.where(mask, -1e30, s)
        s = s - jnp.max(s, axis=-1, keepdims=True)
        p = jnp.exp(s)
        p = p * pl.reciprocal(jnp.sum(p, axis=-1, keepdims=True), approx=True)
        outs.append(jnp.dot(p, vh, preferred_element_type=jnp.float32))
    # single lane-dense (Tq, D) store
    o_ref[0] = jnp.concatenate(outs, axis=-1).astype(o_ref.dtype)


def multi_head_attention(q, k, v, *, n_heads, scale, causal):
    """q: (B, Tq, D), k/v: (B, Tk, D). One grid step per batch element,
    all heads handled inside the kernel (no B*H tiny-block grid)."""
    b, tq, d = q.shape
    tk_len = k.shape[1]
    tqp = _round_up(tq, 8)
    tkp = _round_up(tk_len, 8)
    if tqp != tq:
        q = jnp.pad(q, ((0, 0), (0, tqp - tq), (0, 0)))
    if tkp != tk_len:
        k = jnp.pad(k, ((0, 0), (0, tkp - tk_len), (0, 0)))
        v = jnp.pad(v, ((0, 0), (0, tkp - tk_len), (0, 0)))

    out = pl.pallas_call(
        functools.partial(_mha_kernel, n_heads=n_heads, inv_scale=1.0 / scale,
                          causal=causal, kv_len=tk_len),
        out_shape=jax.ShapeDtypeStruct((b, tqp, d), q.dtype),
        grid=(b,),
        in_specs=[pl.BlockSpec((1, tqp, d), lambda i: (i, 0, 0)),
                  pl.BlockSpec((1, tkp, d), lambda i: (i, 0, 0)),
                  pl.BlockSpec((1, tkp, d), lambda i: (i, 0, 0))],
        out_specs=pl.BlockSpec((1, tqp, d), lambda i: (i, 0, 0)),
        compiler_params=pltpu.CompilerParams(dimension_semantics=("parallel",)),
    )(q, k, v)
    return out[:, :tq, :]


# --------------------------- model building blocks --------------------------

def multi_head(p, query, key, value, *, n_heads, scale, causal):
    d = p["wq"].shape[1]
    if (query is key) and (key is value):
        # fused QKV projection: one lane-dense [d, 3d] matmul
        w = jnp.concatenate([p["wq"], p["wk"], p["wv"]], axis=1)
        bias = jnp.concatenate([p["bq"], p["bk"], p["bv"]], axis=1)
        qkv = linear(query, w, bias)
        q, k, v = qkv[..., :d], qkv[..., d:2 * d], qkv[..., 2 * d:]
    else:
        q = linear(query, p["wq"], p["bq"])
        if key is value:
            wkv = jnp.concatenate([p["wk"], p["wv"]], axis=1)
            bkv = jnp.concatenate([p["bk"], p["bv"]], axis=1)
            kv = linear(key, wkv, bkv)
            k, v = kv[..., :d], kv[..., d:]
        else:
            k = linear(key, p["wk"], p["bk"])
            v = linear(value, p["wv"], p["bv"])
    o = multi_head_attention(q, k, v, n_heads=n_heads, scale=scale, causal=causal)
    return linear(o, p["wo"], p["bo"])


def feed_forward(p, x):
    h = linear(x, p["w1"], p["b1"], activation="relu")
    return linear(h, p["w2"], p["b2"])


def encoder_layer_forward(p, x, *, n_heads, scale):
    a = multi_head(p["selfattn"]["mh"], x, x, x, n_heads=n_heads, scale=scale, causal=False)
    x = residual_layer_norm(x, a, p["selfattn"]["g"], p["selfattn"]["b"])
    f = feed_forward(p["ff"]["ff"], x)
    x = residual_layer_norm(x, f, p["ff"]["g"], p["ff"]["b"])
    return x


def decoder_layer_forward(p, x, enc, *, n_heads, scale):
    a = multi_head(p["selfattn"]["mh"], x, x, x, n_heads=n_heads, scale=scale, causal=True)
    x = residual_layer_norm(x, a, p["selfattn"]["g"], p["selfattn"]["b"])
    a = multi_head(p["crossattn"]["mh"], x, enc, enc, n_heads=n_heads, scale=scale, causal=False)
    x = residual_layer_norm(x, a, p["crossattn"]["g"], p["crossattn"]["b"])
    f = feed_forward(p["ff"]["ff"], x)
    x = residual_layer_norm(x, f, p["ff"]["g"], p["ff"]["b"])
    return x


def positional_encodings(t, d, dtype=DTYPE):
    positions = jnp.arange(t, dtype=jnp.float32)
    channels = jnp.arange(0, d, 2, dtype=jnp.float32) / d
    channels = 1.0 / (10000.0 ** channels)
    enc = positions[:, None] * channels[None, :]             # (T, D//2)
    enc = jnp.stack((jnp.sin(enc), jnp.cos(enc)), axis=-1)   # interleaved sin/cos
    return enc.reshape(t, d).astype(dtype)


def embed(tokens, out_w, d_model):
    # F.embedding(x, out.weight * sqrt(d_model)); out.weight == out_w.T here
    # TODO(synk): embedding gather stays in plain JAX (no rectangular BlockSpec).
    emb = out_w.T * math.sqrt(d_model)                       # (vocab, d_model)
    return jnp.take(emb, tokens, axis=0)


def encoder_forward(p, tokens, *, d_model, n_heads):
    x = embed(tokens, p["out_w"], d_model)
    x = x + positional_encodings(x.shape[1], d_model)[None]
    # NOTE: Attention() is built with d_key=args.d_model -> scale = sqrt(d_model)
    scale = math.sqrt(d_model)
    encodings = []
    for lp in p["layers"]:
        x = encoder_layer_forward(lp, x, n_heads=n_heads, scale=scale)
        encodings.append(x)
    return encodings


def decoder_forward(p, tokens, encodings, *, d_model, n_heads):
    x = embed(tokens, p["out_w"], d_model)
    x = x + positional_encodings(x.shape[1], d_model)[None]
    scale = math.sqrt(d_model)
    for lp, enc in zip(p["layers"], encodings):
        x = decoder_layer_forward(lp, x, enc, n_heads=n_heads, scale=scale)
    return linear(x, p["out_w"], p["out_b"])                 # logits (B, T, vocab)


def transformer_forward(params, encoder_inputs, decoder_inputs, *, d_model, n_heads):
    # dropout layers are identity in eval mode (drop_ratio ignored)
    encodings = encoder_forward(params["encoder"], encoder_inputs,
                                d_model=d_model, n_heads=n_heads)
    return decoder_forward(params["decoder"], decoder_inputs, encodings,
                           d_model=d_model, n_heads=n_heads)


# --------------------------- deterministic init ------------------------------

def init_linear_params(key, d_in, d_out):
    w = jax.random.normal(key, (d_in, d_out), DTYPE) * (1.0 / math.sqrt(d_in))
    b = jnp.zeros((1, d_out), DTYPE)
    return w, b


def init_multihead(key, d_model):
    p = {}
    for name, k in zip(("q", "k", "v", "o"), jax.random.split(key, 4)):
        w, b = init_linear_params(k, d_model, d_model)
        p[f"w{name}"] = w
        p[f"b{name}"] = b
    return p


def init_ln(d_model):
    return jnp.ones((1, d_model), DTYPE), jnp.zeros((1, d_model), DTYPE)


def init_ff(key, d_model, d_hidden):
    k1, k2 = jax.random.split(key)
    w1, b1 = init_linear_params(k1, d_model, d_hidden)
    w2, b2 = init_linear_params(k2, d_hidden, d_model)
    return {"w1": w1, "b1": b1, "w2": w2, "b2": b2}


def init_encoder_layer(key, d_model, d_hidden):
    k1, k2 = jax.random.split(key)
    g1, be1 = init_ln(d_model)
    g2, be2 = init_ln(d_model)
    return {"selfattn": {"mh": init_multihead(k1, d_model), "g": g1, "b": be1},
            "ff": {"ff": init_ff(k2, d_model, d_hidden), "g": g2, "b": be2}}


def init_decoder_layer(key, d_model, d_hidden):
    k1, k2, k3 = jax.random.split(key, 3)
    g1, be1 = init_ln(d_model)
    g2, be2 = init_ln(d_model)
    g3, be3 = init_ln(d_model)
    return {"selfattn": {"mh": init_multihead(k1, d_model), "g": g1, "b": be1},
            "crossattn": {"mh": init_multihead(k2, d_model), "g": g2, "b": be2},
            "ff": {"ff": init_ff(k3, d_model, d_hidden), "g": g3, "b": be3}}


def init_transformer(key, *, d_model, d_hidden, n_heads, n_layers, src_vocab, trg_vocab):
    keys = jax.random.split(key, 2 * n_layers + 2)
    src_out_w, src_out_b = init_linear_params(keys[0], d_model, src_vocab)
    trg_out_w, trg_out_b = init_linear_params(keys[1], d_model, trg_vocab)
    enc_layers = [init_encoder_layer(keys[2 + i], d_model, d_hidden) for i in range(n_layers)]
    dec_layers = [init_decoder_layer(keys[2 + n_layers + i], d_model, d_hidden)
                  for i in range(n_layers)]
    return {"encoder": {"out_w": src_out_w, "out_b": src_out_b, "layers": enc_layers},
            "decoder": {"out_w": trg_out_w, "out_b": trg_out_b, "layers": dec_layers}}


# --------------------------- main --------------------------------------------

if __name__ == "__main__":
    d_model, d_hidden, n_heads, n_layers = 32, 64, 4, 2
    src_vocab, trg_vocab = 40, 48
    batch, s_src, s_trg = 2, 8, 8

    key = jax.random.PRNGKey(0)
    k_enc, k_dec, k_params = jax.random.split(key, 3)
    encoder_inputs = jax.random.randint(k_enc, (batch, s_src), 0, src_vocab, jnp.int32)
    decoder_inputs = jax.random.randint(k_dec, (batch, s_trg), 0, trg_vocab, jnp.int32)

    params = init_transformer(k_params, d_model=d_model, d_hidden=d_hidden,
                              n_heads=n_heads, n_layers=n_layers,
                              src_vocab=src_vocab, trg_vocab=trg_vocab)

    fwd = jax.jit(functools.partial(transformer_forward, d_model=d_model, n_heads=n_heads))
    logits = fwd(params, encoder_inputs, decoder_inputs)
    jax.block_until_ready(logits)

    assert logits.shape == (batch, s_trg, trg_vocab), logits.shape
    assert bool(jnp.all(jnp.isfinite(logits)))
    print("KERNEL_OK")
</pallas_src>

<mosaic_0001>
module attributes {stable_mosaic.version = 11 : i64} {
  func.func @_linear_kernel(%arg0: i32, %arg1: i32, %arg2: i32, %arg3: memref<16x128xf32, #tpu.memory_space<vmem>>, %arg4: memref<128x128xf32, #tpu.memory_space<vmem>>, %arg5: memref<1x128xf32, #tpu.memory_space<vmem>>, %arg6: memref<16x128xf32, #tpu.memory_space<vmem>>, %arg7: memref<16x128xf32, #tpu.memory_space<vmem>>) attributes {dimension_semantics = [#tpu.dimension_semantics<parallel>, #tpu.dimension_semantics<parallel>, #tpu.dimension_semantics<arbitrary>], iteration_bounds = array<i64: 1, 1, 1>, scalar_prefetch = 0 : i64, scratch_operands = 1 : i64, tpu.core_type = #tpu.core_type<tc>, window_params = [{transform_indices = @transform_0, window_bounds = array<i64: 16, 128>}, {transform_indices = @transform_1, window_bounds = array<i64: 128, 128>}, {transform_indices = @transform_2, window_bounds = array<i64: 1, 128>}, {transform_indices = @transform_3, window_bounds = array<i64: 16, 128>}]} {
    %c0_i32 = arith.constant 0 : i32
    %0 = arith.cmpi eq, %arg2, %c0_i32 : i32
    %1 = arith.extui %0 : i1 to i32
    %c0_i32_0 = arith.constant 0 : i32
    %2 = arith.cmpi ne, %1, %c0_i32_0 : i32
    scf.if %2 {
      %cst_10 = arith.constant 0.000000e+00 : f32
      %12 = vector.broadcast %cst_10 : f32 to vector<16x128xf32>
      %c0_11 = arith.constant 0 : index
      %c0_12 = arith.constant 0 : index
      %13 = vector.load %arg7[%c0_11, %c0_12] : memref<16x128xf32, #tpu.memory_space<vmem>>, vector<16x128xf32>
      tpu.vector_store %arg7[%c0_11, %c0_12], %12 {strides = array<i32>} : memref<16x128xf32, #tpu.memory_space<vmem>>, vector<16x128xf32>,
    } else {
    }
    %c0 = arith.constant 0 : index
    %c0_1 = arith.constant 0 : index
    %3 = vector.load %arg7[%c0, %c0_1] : memref<16x128xf32, #tpu.memory_space<vmem>>, vector<16x128xf32>
    %c0_2 = arith.constant 0 : index
    %c0_3 = arith.constant 0 : index
    %4 = vector.load %arg3[%c0_2, %c0_3] : memref<16x128xf32, #tpu.memory_space<vmem>>, vector<16x128xf32>
    %c0_4 = arith.constant 0 : index
    %c0_5 = arith.constant 0 : index
    %5 = vector.load %arg4[%c0_4, %c0_5] : memref<128x128xf32, #tpu.memory_space<vmem>>, vector<128x128xf32>
    %cst = arith.constant dense<0.000000e+00> : vector<16x128xf32>
    %6 = tpu.matmul %4, %5, %cst {dimension_numbers = #tpu.dot_dimension_numbers<[1], [0], [0], [1], [0, 0, 1, 1], [], []>} : vector<16x128xf32>, vector<128x128xf32>, vector<16x128xf32> -> vector<16x128xf32>
    %7 = arith.addf %3, %6 : vector<16x128xf32>
    %c0_6 = arith.constant 0 : index
    %c0_7 = arith.constant 0 : index
    %8 = vector.load %arg7[%c0_6, %c0_7] : memref<16x128xf32, #tpu.memory_space<vmem>>, vector<16x128xf32>
    tpu.vector_store %arg7[%c0_6, %c0_7], %7 {strides = array<i32>} : memref<16x128xf32, #tpu.memory_space<vmem>>, vector<16x128xf32>,
    %c0_i32_8 = arith.constant 0 : i32
    %9 = arith.cmpi eq, %arg2, %c0_i32_8 : i32
    %10 = arith.extui %9 : i1 to i32
    %c0_i32_9 = arith.constant 0 : i32
    %11 = arith.cmpi ne, %10, %c0_i32_9 : i32
    scf.if %11 {
      %c0_10 = arith.constant 0 : index
      %c0_11 = arith.constant 0 : index
      %12 = vector.load %arg7[%c0_10, %c0_11] : memref<16x128xf32, #tpu.memory_space<vmem>>, vector<16x128xf32>
      %c0_12 = arith.constant 0 : index
      %c0_13 = arith.constant 0 : index
      %13 = vector.load %arg5[%c0_12, %c0_13] : memref<1x128xf32, #tpu.memory_space<vmem>>, vector<1x128xf32>
      %14 = vector.broadcast %13 : vector<1x128xf32> to vector<16x128xf32>
      %15 = arith.addf %12, %14 : vector<16x128xf32>
      %c0_14 = arith.constant 0 : index
      %c0_15 = arith.constant 0 : index
      %16 = vector.load %arg6[%c0_14, %c0_15] : memref<16x128xf32, #tpu.memory_space<vmem>>, vector<16x128xf32>
      tpu.vector_store %arg6[%c0_14, %c0_15], %15 {strides = array<i32>} : memref<16x128xf32, #tpu.memory_space<vmem>>, vector<16x128xf32>,
    } else {
    }
    return
  }
  func.func @transform_0(%arg0: i32, %arg1: i32, %arg2: i32) -> (i32, i32) {
    %c0_i32 = arith.constant 0 : i32
    return %arg0, %arg2 : i32, i32
  }
  func.func @transform_1(%arg0: i32, %arg1: i32, %arg2: i32) -> (i32, i32) {
    %c0_i32 = arith.constant 0 : i32
    return %arg2, %arg1 : i32, i32
  }
  func.func @transform_2(%arg0: i32, %arg1: i32, %arg2: i32) -> (i32, i32) {
    %c0_i32 = arith.constant 0 : i32
    %c0_i32_0 = arith.constant 0 : i32
    return %c0_i32, %arg1 : i32, i32
  }
  func.func @transform_3(%arg0: i32, %arg1: i32, %arg2: i32) -> (i32, i32) {
    %c0_i32 = arith.constant 0 : i32
    return %arg0, %arg1 : i32, i32
  }
}

module attributes {stable_mosaic.version = 11 : i64} {
  func.func @_mha_kernel(%arg0: i32, %arg1: memref<1x8x32xf32, #tpu.memory_space<vmem>>, %arg2: memref<1x8x32xf32, #tpu.memory_space<vmem>>, %arg3: memref<1x8x32xf32, #tpu.memory_space<vmem>>, %arg4: memref<1x8x32xf32, #tpu.memory_space<vmem>>) attributes {dimension_semantics = [#tpu.dimension_semantics<parallel>], iteration_bounds = array<i64: 2>, scalar_prefetch = 0 : i64, scratch_operands = 0 : i64, tpu.core_type = #tpu.core_type<tc>, window_params = [{transform_indices = @transform_0, window_bounds = array<i64: 1, 8, 32>}, {transform_indices = @transform_1, window_bounds = array<i64: 1, 8, 32>}, {transform_indices = @transform_2, window_bounds = array<i64: 1, 8, 32>}, {transform_indices = @transform_3, window_bounds = array<i64: 1, 8, 32>}]} {
    %c0 = arith.constant 0 : index
    %c0_0 = arith.constant 0 : index
    %c0_1 = arith.constant 0 : index
    %0 = vector.load %arg1[%c0, %c0_0, %c0_1] : memref<1x8x32xf32, #tpu.memory_space<vmem>>, vector<1x8x32xf32>
    %1 = vector.shape_cast %0 : vector<1x8x32xf32> to vector<8x32xf32>
    %c0_2 = arith.constant 0 : index
    %c0_3 = arith.constant 0 : index
    %c0_4 = arith.constant 0 : index
    %2 = vector.load %arg2[%c0_2, %c0_3, %c0_4] : memref<1x8x32xf32, #tpu.memory_space<vmem>>, vector<1x8x32xf32>
    %3 = vector.shape_cast %2 : vector<1x8x32xf32> to vector<8x32xf32>
    %c0_5 = arith.constant 0 : index
    %c0_6 = arith.constant 0 : index
    %c0_7 = arith.constant 0 : index
    %4 = vector.load %arg3[%c0_5, %c0_6, %c0_7] : memref<1x8x32xf32, #tpu.memory_space<vmem>>, vector<1x8x32xf32>
    %5 = vector.shape_cast %4 : vector<1x8x32xf32> to vector<8x32xf32>
    %6 = tpu.iota {dimensions = array<i32: 1>} : vector<8x8xi32>
    %c8_i32 = arith.constant 8 : i32
    %7 = vector.broadcast %c8_i32 : i32 to vector<8x8xi32>
    %8 = arith.cmpi sge, %6, %7 : vector<8x8xi32>
    %9 = vector.extract_strided_slice %1 {offsets = [0, 0], sizes = [8, 8], strides = [1, 1]} : vector<8x32xf32> to vector<8x8xf32>
    %10 = vector.extract_strided_slice %3 {offsets = [0, 0], sizes = [8, 8], strides = [1, 1]} : vector<8x32xf32> to vector<8x8xf32>
    %11 = vector.extract_strided_slice %5 {offsets = [0, 0], sizes = [8, 8], strides = [1, 1]} : vector<8x32xf32> to vector<8x8xf32>
    %cst = arith.constant dense<0.000000e+00> : vector<8x8xf32>
    %12 = tpu.matmul %9, %10, %cst {dimension_numbers = #tpu.dot_dimension_numbers<[1], [1], [0], [0], [0, 0, 1, 0], [], []>} : vector<8x8xf32>, vector<8x8xf32>, vector<8x8xf32> -> vector<8x8xf32>
    %cst_8 = arith.constant 0.176776692 : f32
    %13 = vector.broadcast %cst_8 : f32 to vector<8x8xf32>
    %14 = arith.mulf %12, %13 : vector<8x8xf32>
    %cst_9 = arith.constant -1.000000e+30 : f32
    %15 = vector.broadcast %cst_9 : f32 to vector<8x8xf32>
    %16 = arith.select %8, %15, %14 : vector<8x8xi1>, vector<8x8xf32>
    %cst_10 = arith.constant dense<0xFF800000> : vector<8xf32>
    %17 = vector.multi_reduction <maximumf>, %16, %cst_10 [1] : vector<8x8xf32> to vector<8xf32>
    %18 = vector.shape_cast %17 : vector<8xf32> to vector<8x1xf32>
    %19 = vector.broadcast %18 : vector<8x1xf32> to vector<8x8xf32>
    %20 = arith.subf %16, %19 : vector<8x8xf32>
    %21 = math.exp %20 : vector<8x8xf32>
    %cst_11 = arith.constant dense<0.000000e+00> : vector<8xf32>
    %22 = vector.multi_reduction <add>, %21, %cst_11 [1] : vector<8x8xf32> to vector<8xf32>
    %23 = vector.shape_cast %22 : vector<8xf32> to vector<8x1xf32>
    %24 = tpu.reciprocal %23 {approx = true} : vector<8x1xf32> -> vector<8x1xf32>
    %25 = vector.broadcast %24 : vector<8x1xf32> to vector<8x8xf32>
    %26 = arith.mulf %21, %25 : vector<8x8xf32>
    %cst_12 = arith.constant dense<0.000000e+00> : vector<8x8xf32>
    %27 = tpu.matmul %26, %11, %cst_12 {dimension_numbers = #tpu.dot_dimension_numbers<[1], [0], [0], [1], [0, 0, 1, 1], [], []>} : vector<8x8xf32>, vector<8x8xf32>, vector<8x8xf32> -> vector<8x8xf32>
    %28 = vector.extract_strided_slice %1 {offsets = [0, 8], sizes = [8, 8], strides = [1, 1]} : vector<8x32xf32> to vector<8x8xf32>
    %29 = vector.extract_strided_slice %3 {offsets = [0, 8], sizes = [8, 8], strides = [1, 1]} : vector<8x32xf32> to vector<8x8xf32>
    %30 = vector.extract_strided_slice %5 {offsets = [0, 8], sizes = [8, 8], strides = [1, 1]} : vector<8x32xf32> to vector<8x8xf32>
    %cst_13 = arith.constant dense<0.000000e+00> : vector<8x8xf32>
    %31 = tpu.matmul %28, %29, %cst_13 {dimension_numbers = #tpu.dot_dimension_numbers<[1], [1], [0], [0], [0, 0, 1, 0], [], []>} : vector<8x8xf32>, vector<8x8xf32>, vector<8x8xf32> -> vector<8x8xf32>
    %cst_14 = arith.constant 0.176776692 : f32
    %32 = vector.broadcast %cst_14 : f32 to vector<8x8xf32>
    %33 = arith.mulf %31, %32 : vector<8x8xf32>
    %cst_15 = arith.constant -1.000000e+30 : f32
    %34 = vector.broadcast %cst_15 : f32 to vector<8x8xf32>
    %35 = arith.select %8, %34, %33 : vector<8x8xi1>, vector<8x8xf32>
    %cst_16 = arith.constant dense<0xFF800000> : vector<8xf32>
    %36 = vector.multi_reduction <maximumf>, %35, %cst_16 [1] : vector<8x8xf32> to vector<8xf32>
    %37 = vector.shape_cast %36 : vector<8xf32> to vector<8x1xf32>
    %38 = vector.broadcast %37 : vector<8x1xf32> to vector<8x8xf32>
    %39 = arith.subf %35, %38 : vector<8x8xf32>
    %40 = math.exp %39 : vector<8x8xf32>
    %cst_17 = arith.constant dense<0.000000e+00> : vector<8xf32>
    %41 = vector.multi_reduction <add>, %40, %cst_17 [1] : vector<8x8xf32> to vector<8xf32>
    %42 = vector.shape_cast %41 : vector<8xf32> to vector<8x1xf32>
    %43 = tpu.reciprocal %42 {approx = true} : vector<8x1xf32> -> vector<8x1xf32>
    %44 = vector.broadcast %43 : vector<8x1xf32> to vector<8x8xf32>
    %45 = arith.mulf %40, %44 : vector<8x8xf32>
    %cst_18 = arith.constant dense<0.000000e+00> : vector<8x8xf32>
    %46 = tpu.matmul %45, %30, %cst_18 {dimension_numbers = #tpu.dot_dimension_numbers<[1], [0], [0], [1], [0, 0, 1, 1], [], []>} : vector<8x8xf32>, vector<8x8xf32>, vector<8x8xf32> -> vector<8x8xf32>
    %47 = vector.extract_strided_slice %1 {offsets = [0, 16], sizes = [8, 8], strides = [1, 1]} : vector<8x32xf32> to vector<8x8xf32>
    %48 = vector.extract_strided_slice %3 {offsets = [0, 16], sizes = [8, 8], strides = [1, 1]} : vector<8x32xf32> to vector<8x8xf32>
    %49 = vector.extract_strided_slice %5 {offsets = [0, 16], sizes = [8, 8], strides = [1, 1]} : vector<8x32xf32> to vector<8x8xf32>
    %cst_19 = arith.constant dense<0.000000e+00> : vector<8x8xf32>
    %50 = tpu.matmul %47, %48, %cst_19 {dimension_numbers = #tpu.dot_dimension_numbers<[1], [1], [0], [0], [0, 0, 1, 0], [], []>} : vector<8x8xf32>, vector<8x8xf32>, vector<8x8xf32> -> vector<8x8xf32>
    %cst_20 = arith.constant 0.176776692 : f32
    %51 = vector.broadcast %cst_20 : f32 to vector<8x8xf32>
    %52 = arith.mulf %50, %51 : vector<8x8xf32>
    %cst_21 = arith.constant -1.000000e+30 : f32
    %53 = vector.broadcast %cst_21 : f32 to vector<8x8xf32>
    %54 = arith.select %8, %53, %52 : vector<8x8xi1>, vector<8x8xf32>
    %cst_22 = arith.constant dense<0xFF800000> : vector<8xf32>
    %55 = vector.multi_reduction <maximumf>, %54, %cst_22 [1] : vector<8x8xf32> to vector<8xf32>
    %56 = vector.shape_cast %55 : vector<8xf32> to vector<8x1xf32>
    %57 = vector.broadcast %56 : vector<8x1xf32> to vector<8x8xf32>
    %58 = arith.subf %54, %57 : vector<8x8xf32>
    %59 = math.exp %58 : vector<8x8xf32>
    %cst_23 = arith.constant dense<0.000000e+00> : vector<8xf32>
    %60 = vector.multi_reduction <add>, %59, %cst_23 [1] : vector<8x8xf32> to vector<8xf32>
    %61 = vector.shape_cast %60 : vector<8xf32> to vector<8x1xf32>
    %62 = tpu.reciprocal %61 {approx = true} : vector<8x1xf32> -> vector<8x1xf32>
    %63 = vector.broadcast %62 : vector<8x1xf32> to vector<8x8xf32>
    %64 = arith.mulf %59, %63 : vector<8x8xf32>
    %cst_24 = arith.constant dense<0.000000e+00> : vector<8x8xf32>
    %65 = tpu.matmul %64, %49, %cst_24 {dimension_numbers = #tpu.dot_dimension_numbers<[1], [0], [0], [1], [0, 0, 1, 1], [], []>} : vector<8x8xf32>, vector<8x8xf32>, vector<8x8xf32> -> vector<8x8xf32>
    %66 = vector.extract_strided_slice %1 {offsets = [0, 24], sizes = [8, 8], strides = [1, 1]} : vector<8x32xf32> to vector<8x8xf32>
    %67 = vector.extract_strided_slice %3 {offsets = [0, 24], sizes = [8, 8], strides = [1, 1]} : vector<8x32xf32> to vector<8x8xf32>
    %68 = vector.extract_strided_slice %5 {offsets = [0, 24], sizes = [8, 8], strides = [1, 1]} : vector<8x32xf32> to vector<8x8xf32>
    %cst_25 = arith.constant dense<0.000000e+00> : vector<8x8xf32>
    %69 = tpu.matmul %66, %67, %cst_25 {dimension_numbers = #tpu.dot_dimension_numbers<[1], [1], [0], [0], [0, 0, 1, 0], [], []>} : vector<8x8xf32>, vector<8x8xf32>, vector<8x8xf32> -> vector<8x8xf32>
    %cst_26 = arith.constant 0.176776692 : f32
    %70 = vector.broadcast %cst_26 : f32 to vector<8x8xf32>
    %71 = arith.mulf %69, %70 : vector<8x8xf32>
    %cst_27 = arith.constant -1.000000e+30 : f32
    %72 = vector.broadcast %cst_27 : f32 to vector<8x8xf32>
    %73 = arith.select %8, %72, %71 : vector<8x8xi1>, vector<8x8xf32>
    %cst_28 = arith.constant dense<0xFF800000> : vector<8xf32>
    %74 = vector.multi_reduction <maximumf>, %73, %cst_28 [1] : vector<8x8xf32> to vector<8xf32>
    %75 = vector.shape_cast %74 : vector<8xf32> to vector<8x1xf32>
    %76 = vector.broadcast %75 : vector<8x1xf32> to vector<8x8xf32>
    %77 = arith.subf %73, %76 : vector<8x8xf32>
    %78 = math.exp %77 : vector<8x8xf32>
    %cst_29 = arith.constant dense<0.000000e+00> : vector<8xf32>
    %79 = vector.multi_reduction <add>, %78, %cst_29 [1] : vector<8x8xf32> to vector<8xf32>
    %80 = vector.shape_cast %79 : vector<8xf32> to vector<8x1xf32>
    %81 = tpu.reciprocal %80 {approx = true} : vector<8x1xf32> -> vector<8x1xf32>
    %82 = vector.broadcast %81 : vector<8x1xf32> to vector<8x8xf32>
    %83 = arith.mulf %78, %82 : vector<8x8xf32>
    %cst_30 = arith.constant dense<0.000000e+00> : vector<8x8xf32>
    %84 = tpu.matmul %83, %68, %cst_30 {dimension_numbers = #tpu.dot_dimension_numbers<[1], [0], [0], [1], [0, 0, 1, 1], [], []>} : vector<8x8xf32>, vector<8x8xf32>, vector<8x8xf32> -> vector<8x8xf32>
    %85 = tpu.concatenate %27, %46, %65, %84 in 1 : vector<8x8xf32>, vector<8x8xf32>, vector<8x8xf32>, vector<8x8xf32> -> vector<8x32xf32>
    %c0_31 = arith.constant 0 : index
    %c0_32 = arith.constant 0 : index
    %c0_33 = arith.constant 0 : index
    %86 = vector.load %arg4[%c0_31, %c0_32, %c0_33] : memref<1x8x32xf32, #tpu.memory_space<vmem>>, vector<1x8x32xf32>
    %87 = vector.shape_cast %86 : vector<1x8x32xf32> to vector<8x32xf32>
    %88 = vector.shape_cast %85 : vector<8x32xf32> to vector<1x8x32xf32>
    tpu.vector_store %arg4[%c0_31, %c0_32, %c0_33], %88 {strides = array<i32>} : memref<1x8x32xf32, #tpu.memory_space<vmem>>, vector<1x8x32xf32>,
    return
  }
  func.func @transform_0(%arg0: i32) -> (i32, i32, i32) {
    %c0_i32 = arith.constant 0 : i32
    %c0_i32_0 = arith.constant 0 : i32
    %c0_i32_1 = arith.constant 0 : i32
    return %arg0, %c0_i32, %c0_i32_0 : i32, i32, i32
  }
  func.func @transform_1(%arg0: i32) -> (i32, i32, i32) {
    %c0_i32 = arith.constant 0 : i32
    %c0_i32_0 = arith.constant 0 : i32
    %c0_i32_1 = arith.constant 0 : i32
    return %arg0, %c0_i32, %c0_i32_0 : i32, i32, i32
  }
  func.func @transform_2(%arg0: i32) -> (i32, i32, i32) {
    %c0_i32 = arith.constant 0 : i32
    %c0_i32_0 = arith.constant 0 : i32
    %c0_i32_1 = arith.constant 0 : i32
    return %arg0, %c0_i32, %c0_i32_0 : i32, i32, i32
  }
  func.func @transform_3(%arg0: i32) -> (i32, i32, i32) {
    %c0_i32 = arith.constant 0 : i32
    %c0_i32_0 = arith.constant 0 : i32
    %c0_i32_1 = arith.constant 0 : i32
    return %arg0, %c0_i32, %c0_i32_0 : i32, i32, i32
  }
}

module attributes {stable_mosaic.version = 11 : i64} {
  func.func @_add_ln_kernel(%arg0: i32, %arg1: memref<16x32xf32, #tpu.memory_space<vmem>>, %arg2: memref<16x32xf32, #tpu.memory_space<vmem>>, %arg3: memref<1x32xf32, #tpu.memory_space<vmem>>, %arg4: memref<1x32xf32, #tpu.memory_space<vmem>>, %arg5: memref<16x32xf32, #tpu.memory_space<vmem>>) attributes {dimension_semantics = [#tpu.dimension_semantics<parallel>], iteration_bounds = array<i64: 1>, scalar_prefetch = 0 : i64, scratch_operands = 0 : i64, tpu.core_type = #tpu.core_type<tc>, window_params = [{transform_indices = @transform_0, window_bounds = array<i64: 16, 32>}, {transform_indices = @transform_1, window_bounds = array<i64: 16, 32>}, {pipeline_mode = #tpu.pipeline_mode<synchronous>, transform_indices = @transform_2, window_bounds = array<i64: 1, 32>}, {pipeline_mode = #tpu.pipeline_mode<synchronous>, transform_indices = @transform_3, window_bounds = array<i64: 1, 32>}, {transform_indices = @transform_4, window_bounds = array<i64: 16, 32>}]} {
    %c0 = arith.constant 0 : index
    %c0_0 = arith.constant 0 : index
    %0 = vector.load %arg1[%c0, %c0_0] : memref<16x32xf32, #tpu.memory_space<vmem>>, vector<16x32xf32>
    %c0_1 = arith.constant 0 : index
    %c0_2 = arith.constant 0 : index
    %1 = vector.load %arg2[%c0_1, %c0_2] : memref<16x32xf32, #tpu.memory_space<vmem>>, vector<16x32xf32>
    %cst = arith.constant dense<0.000000e+00> : vector<16xf32>
    %2 = vector.multi_reduction <add>, %1, %cst [1] : vector<16x32xf32> to vector<16xf32>
    %3 = vector.shape_cast %2 : vector<16xf32> to vector<16x1xf32>
    %cst_3 = arith.constant 3.200000e+01 : f32
    %4 = vector.broadcast %cst_3 : f32 to vector<16x1xf32>
    %5 = arith.divf %3, %4 : vector<16x1xf32>
    %6 = vector.broadcast %5 : vector<16x1xf32> to vector<16x32xf32>
    %7 = arith.subf %1, %6 : vector<16x32xf32>
    %8 = arith.mulf %7, %7 : vector<16x32xf32>
    %cst_4 = arith.constant dense<0.000000e+00> : vector<16xf32>
    %9 = vector.multi_reduction <add>, %8, %cst_4 [1] : vector<16x32xf32> to vector<16xf32>
    %10 = vector.shape_cast %9 : vector<16xf32> to vector<16x1xf32>
    %cst_5 = arith.constant 0.0322580636 : f32
    %11 = vector.broadcast %cst_5 : f32 to vector<16x1xf32>
    %12 = arith.mulf %10, %11 : vector<16x1xf32>
    %13 = math.sqrt %12 : vector<16x1xf32>
    %cst_6 = arith.constant 9.99999997E-7 : f32
    %14 = vector.broadcast %cst_6 : f32 to vector<16x1xf32>
    %15 = arith.addf %13, %14 : vector<16x1xf32>
    %16 = tpu.reciprocal %15 {approx = true} : vector<16x1xf32> -> vector<16x1xf32>
    %c0_7 = arith.constant 0 : index
    %c0_8 = arith.constant 0 : index
    %17 = vector.load %arg3[%c0_7, %c0_8] : memref<1x32xf32, #tpu.memory_space<vmem>>, vector<1x32xf32>
    %18 = vector.broadcast %17 : vector<1x32xf32> to vector<16x32xf32>
    %19 = arith.mulf %18, %7 : vector<16x32xf32>
    %20 = vector.broadcast %16 : vector<16x1xf32> to vector<16x32xf32>
    %21 = arith.mulf %19, %20 : vector<16x32xf32>
    %22 = arith.addf %0, %21 : vector<16x32xf32>
    %c0_9 = arith.constant 0 : index
    %c0_10 = arith.constant 0 : index
    %23 = vector.load %arg4[%c0_9, %c0_10] : memref<1x32xf32, #tpu.memory_space<vmem>>, vector<1x32xf32>
    %24 = vector.broadcast %23 : vector<1x32xf32> to vector<16x32xf32>
    %25 = arith.addf %22, %24 : vector<16x32xf32>
    %c0_11 = arith.constant 0 : index
    %c0_12 = arith.constant 0 : index
    %26 = vector.load %arg5[%c0_11, %c0_12] : memref<16x32xf32, #tpu.memory_space<vmem>>, vector<16x32xf32>
    tpu.vector_store %arg5[%c0_11, %c0_12], %25 {strides = array<i32>} : memref<16x32xf32, #tpu.memory_space<vmem>>, vector<16x32xf32>,
    return
  }
  func.func @transform_0(%arg0: i32) -> (i32, i32) {
    %c0_i32 = arith.constant 0 : i32
    %c0_i32_0 = arith.constant 0 : i32
    return %arg0, %c0_i32 : i32, i32
  }
  func.func @transform_1(%arg0: i32) -> (i32, i32) {
    %c0_i32 = arith.constant 0 : i32
    %c0_i32_0 = arith.constant 0 : i32
    return %arg0, %c0_i32 : i32, i32
  }
  func.func @transform_2(%arg0: i32) -> (i32, i32) {
    %c0_i32 = arith.constant 0 : i32
    %c0_i32_0 = arith.constant 0 : i32
    %c0_i32_1 = arith.constant 0 : i32
    return %c0_i32, %c0_i32_0 : i32, i32
  }
  func.func @transform_3(%arg0: i32) -> (i32, i32) {
    %c0_i32 = arith.constant 0 : i32
    %c0_i32_0 = arith.constant 0 : i32
    %c0_i32_1 = arith.constant 0 : i32
    return %c0_i32, %c0_i32_0 : i32, i32
  }
  func.func @transform_4(%arg0: i32) -> (i32, i32) {
    %c0_i32 = arith.constant 0 : i32
    %c0_i32_0 = arith.constant 0 : i32
    return %arg0, %c0_i32 : i32, i32
  }
}

module attributes {stable_mosaic.version = 11 : i64} {
  func.func @_linear_kernel(%arg0: i32, %arg1: i32, %arg2: i32, %arg3: memref<16x128xf32, #tpu.memory_space<vmem>>, %arg4: memref<128x128xf32, #tpu.memory_space<vmem>>, %arg5: memref<1x128xf32, #tpu.memory_space<vmem>>, %arg6: memref<16x128xf32, #tpu.memory_space<vmem>>, %arg7: memref<16x128xf32, #tpu.memory_space<vmem>>) attributes {dimension_semantics = [#tpu.dimension_semantics<parallel>, #tpu.dimension_semantics<parallel>, #tpu.dimension_semantics<arbitrary>], iteration_bounds = array<i64: 1, 1, 1>, scalar_prefetch = 0 : i64, scratch_operands = 1 : i64, tpu.core_type = #tpu.core_type<tc>, window_params = [{transform_indices = @transform_0, window_bounds = array<i64: 16, 128>}, {transform_indices = @transform_1, window_bounds = array<i64: 128, 128>}, {transform_indices = @transform_2, window_bounds = array<i64: 1, 128>}, {transform_indices = @transform_3, window_bounds = array<i64: 16, 128>}]} {
    %c0_i32 = arith.constant 0 : i32
    %0 = arith.cmpi eq, %arg2, %c0_i32 : i32
    %1 = arith.extui %0 : i1 to i32
    %c0_i32_0 = arith.constant 0 : i32
    %2 = arith.cmpi ne, %1, %c0_i32_0 : i32
    scf.if %2 {
      %cst_10 = arith.constant 0.000000e+00 : f32
      %12 = vector.broadcast %cst_10 : f32 to vector<16x128xf32>
      %c0_11 = arith.constant 0 : index
      %c0_12 = arith.constant 0 : index
      %13 = vector.load %arg7[%c0_11, %c0_12] : memref<16x128xf32, #tpu.memory_space<vmem>>, vector<16x128xf32>
      tpu.vector_store %arg7[%c0_11, %c0_12], %12 {strides = array<i32>} : memref<16x128xf32, #tpu.memory_space<vmem>>, vector<16x128xf32>,
    } else {
    }
    %c0 = arith.constant 0 : index
    %c0_1 = arith.constant 0 : index
    %3 = vector.load %arg7[%c0, %c0_1] : memref<16x128xf32, #tpu.memory_space<vmem>>, vector<16x128xf32>
    %c0_2 = arith.constant 0 : index
    %c0_3 = arith.constant 0 : index
    %4 = vector.load %arg3[%c0_2, %c0_3] : memref<16x128xf32, #tpu.memory_space<vmem>>, vector<16x128xf32>
    %c0_4 = arith.constant 0 : index
    %c0_5 = arith.constant 0 : index
    %5 = vector.load %arg4[%c0_4, %c0_5] : memref<128x128xf32, #tpu.memory_space<vmem>>, vector<128x128xf32>
    %cst = arith.constant dense<0.000000e+00> : vector<16x128xf32>
    %6 = tpu.matmul %4, %5, %cst {dimension_numbers = #tpu.dot_dimension_numbers<[1], [0], [0], [1], [0, 0, 1, 1], [], []>} : vector<16x128xf32>, vector<128x128xf32>, vector<16x128xf32> -> vector<16x128xf32>
    %7 = arith.addf %3, %6 : vector<16x128xf32>
    %c0_6 = arith.constant 0 : index
    %c0_7 = arith.constant 0 : index
    %8 = vector.load %arg7[%c0_6, %c0_7] : memref<16x128xf32, #tpu.memory_space<vmem>>, vector<16x128xf32>
    tpu.vector_store %arg7[%c0_6, %c0_7], %7 {strides = array<i32>} : memref<16x128xf32, #tpu.memory_space<vmem>>, vector<16x128xf32>,
    %c0_i32_8 = arith.constant 0 : i32
    %9 = arith.cmpi eq, %arg2, %c0_i32_8 : i32
    %10 = arith.extui %9 : i1 to i32
    %c0_i32_9 = arith.constant 0 : i32
    %11 = arith.cmpi ne, %10, %c0_i32_9 : i32
    scf.if %11 {
      %c0_10 = arith.constant 0 : index
      %c0_11 = arith.constant 0 : index
      %12 = vector.load %arg7[%c0_10, %c0_11] : memref<16x128xf32, #tpu.memory_space<vmem>>, vector<16x128xf32>
      %c0_12 = arith.constant 0 : index
      %c0_13 = arith.constant 0 : index
      %13 = vector.load %arg5[%c0_12, %c0_13] : memref<1x128xf32, #tpu.memory_space<vmem>>, vector<1x128xf32>
      %14 = vector.broadcast %13 : vector<1x128xf32> to vector<16x128xf32>
      %15 = arith.addf %12, %14 : vector<16x128xf32>
      %cst_14 = arith.constant 0.000000e+00 : f32
      %16 = vector.broadcast %cst_14 : f32 to vector<16x128xf32>
      %17 = arith.maximumf %15, %16 : vector<16x128xf32>
      %c0_15 = arith.constant 0 : index
      %c0_16 = arith.constant 0 : index
      %18 = vector.load %arg6[%c0_15, %c0_16] : memref<16x128xf32, #tpu.memory_space<vmem>>, vector<16x128xf32>
      tpu.vector_store %arg6[%c0_15, %c0_16], %17 {strides = array<i32>} : memref<16x128xf32, #tpu.memory_space<vmem>>, vector<16x128xf32>,
    } else {
    }
    return
  }
  func.func @transform_0(%arg0: i32, %arg1: i32, %arg2: i32) -> (i32, i32) {
    %c0_i32 = arith.constant 0 : i32
    return %arg0, %arg2 : i32, i32
  }
  func.func @transform_1(%arg0: i32, %arg1: i32, %arg2: i32) -> (i32, i32) {
    %c0_i32 = arith.constant 0 : i32
    return %arg2, %arg1 : i32, i32
  }
  func.func @transform_2(%arg0: i32, %arg1: i32, %arg2: i32) -> (i32, i32) {
    %c0_i32 = arith.constant 0 : i32
    %c0_i32_0 = arith.constant 0 : i32
    return %c0_i32, %arg1 : i32, i32
  }
  func.func @transform_3(%arg0: i32, %arg1: i32, %arg2: i32) -> (i32, i32) {
    %c0_i32 = arith.constant 0 : i32
    return %arg0, %arg1 : i32, i32
  }
}

module attributes {stable_mosaic.version = 11 : i64} {
  func.func @_mha_kernel(%arg0: i32, %arg1: memref<1x8x32xf32, #tpu.memory_space<vmem>>, %arg2: memref<1x8x32xf32, #tpu.memory_space<vmem>>, %arg3: memref<1x8x32xf32, #tpu.memory_space<vmem>>, %arg4: memref<1x8x32xf32, #tpu.memory_space<vmem>>) attributes {dimension_semantics = [#tpu.dimension_semantics<parallel>], iteration_bounds = array<i64: 2>, scalar_prefetch = 0 : i64, scratch_operands = 0 : i64, tpu.core_type = #tpu.core_type<tc>, window_params = [{transform_indices = @transform_0, window_bounds = array<i64: 1, 8, 32>}, {transform_indices = @transform_1, window_bounds = array<i64: 1, 8, 32>}, {transform_indices = @transform_2, window_bounds = array<i64: 1, 8, 32>}, {transform_indices = @transform_3, window_bounds = array<i64: 1, 8, 32>}]} {
    %c0 = arith.constant 0 : index
    %c0_0 = arith.constant 0 : index
    %c0_1 = arith.constant 0 : index
    %0 = vector.load %arg1[%c0, %c0_0, %c0_1] : memref<1x8x32xf32, #tpu.memory_space<vmem>>, vector<1x8x32xf32>
    %1 = vector.shape_cast %0 : vector<1x8x32xf32> to vector<8x32xf32>
    %c0_2 = arith.constant 0 : index
    %c0_3 = arith.constant 0 : index
    %c0_4 = arith.constant 0 : index
    %2 = vector.load %arg2[%c0_2, %c0_3, %c0_4] : memref<1x8x32xf32, #tpu.memory_space<vmem>>, vector<1x8x32xf32>
    %3 = vector.shape_cast %2 : vector<1x8x32xf32> to vector<8x32xf32>
    %c0_5 = arith.constant 0 : index
    %c0_6 = arith.constant 0 : index
    %c0_7 = arith.constant 0 : index
    %4 = vector.load %arg3[%c0_5, %c0_6, %c0_7] : memref<1x8x32xf32, #tpu.memory_space<vmem>>, vector<1x8x32xf32>
    %5 = vector.shape_cast %4 : vector<1x8x32xf32> to vector<8x32xf32>
    %6 = tpu.iota {dimensions = array<i32: 1>} : vector<8x8xi32>
    %c8_i32 = arith.constant 8 : i32
    %7 = vector.broadcast %c8_i32 : i32 to vector<8x8xi32>
    %8 = arith.cmpi sge, %6, %7 : vector<8x8xi32>
    %9 = tpu.iota {dimensions = array<i32: 0>} : vector<8x8xi32>
    %10 = arith.cmpi sgt, %6, %9 : vector<8x8xi32>
    %11 = arith.ori %8, %10 : vector<8x8xi1>
    %12 = vector.extract_strided_slice %1 {offsets = [0, 0], sizes = [8, 8], strides = [1, 1]} : vector<8x32xf32> to vector<8x8xf32>
    %13 = vector.extract_strided_slice %3 {offsets = [0, 0], sizes = [8, 8], strides = [1, 1]} : vector<8x32xf32> to vector<8x8xf32>
    %14 = vector.extract_strided_slice %5 {offsets = [0, 0], sizes = [8, 8], strides = [1, 1]} : vector<8x32xf32> to vector<8x8xf32>
    %cst = arith.constant dense<0.000000e+00> : vector<8x8xf32>
    %15 = tpu.matmul %12, %13, %cst {dimension_numbers = #tpu.dot_dimension_numbers<[1], [1], [0], [0], [0, 0, 1, 0], [], []>} : vector<8x8xf32>, vector<8x8xf32>, vector<8x8xf32> -> vector<8x8xf32>
    %cst_8 = arith.constant 0.176776692 : f32
    %16 = vector.broadcast %cst_8 : f32 to vector<8x8xf32>
    %17 = arith.mulf %15, %16 : vector<8x8xf32>
    %cst_9 = arith.constant -1.000000e+30 : f32
    %18 = vector.broadcast %cst_9 : f32 to vector<8x8xf32>
    %19 = arith.select %11, %18, %17 : vector<8x8xi1>, vector<8x8xf32>
    %cst_10 = arith.constant dense<0xFF800000> : vector<8xf32>
    %20 = vector.multi_reduction <maximumf>, %19, %cst_10 [1] : vector<8x8xf32> to vector<8xf32>
    %21 = vector.shape_cast %20 : vector<8xf32> to vector<8x1xf32>
    %22 = vector.broadcast %21 : vector<8x1xf32> to vector<8x8xf32>
    %23 = arith.subf %19, %22 : vector<8x8xf32>
    %24 = math.exp %23 : vector<8x8xf32>
    %cst_11 = arith.constant dense<0.000000e+00> : vector<8xf32>
    %25 = vector.multi_reduction <add>, %24, %cst_11 [1] : vector<8x8xf32> to vector<8xf32>
    %26 = vector.shape_cast %25 : vector<8xf32> to vector<8x1xf32>
    %27 = tpu.reciprocal %26 {approx = true} : vector<8x1xf32> -> vector<8x1xf32>
    %28 = vector.broadcast %27 : vector<8x1xf32> to vector<8x8xf32>
    %29 = arith.mulf %24, %28 : vector<8x8xf32>
    %cst_12 = arith.constant dense<0.000000e+00> : vector<8x8xf32>
    %30 = tpu.matmul %29, %14, %cst_12 {dimension_numbers = #tpu.dot_dimension_numbers<[1], [0], [0], [1], [0, 0, 1, 1], [], []>} : vector<8x8xf32>, vector<8x8xf32>, vector<8x8xf32> -> vector<8x8xf32>
    %31 = vector.extract_strided_slice %1 {offsets = [0, 8], sizes = [8, 8], strides = [1, 1]} : vector<8x32xf32> to vector<8x8xf32>
    %32 = vector.extract_strided_slice %3 {offsets = [0, 8], sizes = [8, 8], strides = [1, 1]} : vector<8x32xf32> to vector<8x8xf32>
    %33 = vector.extract_strided_slice %5 {offsets = [0, 8], sizes = [8, 8], strides = [1, 1]} : vector<8x32xf32> to vector<8x8xf32>
    %cst_13 = arith.constant dense<0.000000e+00> : vector<8x8xf32>
    %34 = tpu.matmul %31, %32, %cst_13 {dimension_numbers = #tpu.dot_dimension_numbers<[1], [1], [0], [0], [0, 0, 1, 0], [], []>} : vector<8x8xf32>, vector<8x8xf32>, vector<8x8xf32> -> vector<8x8xf32>
    %cst_14 = arith.constant 0.176776692 : f32
    %35 = vector.broadcast %cst_14 : f32 to vector<8x8xf32>
    %36 = arith.mulf %34, %35 : vector<8x8xf32>
    %cst_15 = arith.constant -1.000000e+30 : f32
    %37 = vector.broadcast %cst_15 : f32 to vector<8x8xf32>
    %38 = arith.select %11, %37, %36 : vector<8x8xi1>, vector<8x8xf32>
    %cst_16 = arith.constant dense<0xFF800000> : vector<8xf32>
    %39 = vector.multi_reduction <maximumf>, %38, %cst_16 [1] : vector<8x8xf32> to vector<8xf32>
    %40 = vector.shape_cast %39 : vector<8xf32> to vector<8x1xf32>
    %41 = vector.broadcast %40 : vector<8x1xf32> to vector<8x8xf32>
    %42 = arith.subf %38, %41 : vector<8x8xf32>
    %43 = math.exp %42 : vector<8x8xf32>
    %cst_17 = arith.constant dense<0.000000e+00> : vector<8xf32>
    %44 = vector.multi_reduction <add>, %43, %cst_17 [1] : vector<8x8xf32> to vector<8xf32>
    %45 = vector.shape_cast %44 : vector<8xf32> to vector<8x1xf32>
    %46 = tpu.reciprocal %45 {approx = true} : vector<8x1xf32> -> vector<8x1xf32>
    %47 = vector.broadcast %46 : vector<8x1xf32> to vector<8x8xf32>
    %48 = arith.mulf %43, %47 : vector<8x8xf32>
    %cst_18 = arith.constant dense<0.000000e+00> : vector<8x8xf32>
    %49 = tpu.matmul %48, %33, %cst_18 {dimension_numbers = #tpu.dot_dimension_numbers<[1], [0], [0], [1], [0, 0, 1, 1], [], []>} : vector<8x8xf32>, vector<8x8xf32>, vector<8x8xf32> -> vector<8x8xf32>
    %50 = vector.extract_strided_slice %1 {offsets = [0, 16], sizes = [8, 8], strides = [1, 1]} : vector<8x32xf32> to vector<8x8xf32>
    %51 = vector.extract_strided_slice %3 {offsets = [0, 16], sizes = [8, 8], strides = [1, 1]} : vector<8x32xf32> to vector<8x8xf32>
    %52 = vector.extract_strided_slice %5 {offsets = [0, 16], sizes = [8, 8], strides = [1, 1]} : vector<8x32xf32> to vector<8x8xf32>
    %cst_19 = arith.constant dense<0.000000e+00> : vector<8x8xf32>
    %53 = tpu.matmul %50, %51, %cst_19 {dimension_numbers = #tpu.dot_dimension_numbers<[1], [1], [0], [0], [0, 0, 1, 0], [], []>} : vector<8x8xf32>, vector<8x8xf32>, vector<8x8xf32> -> vector<8x8xf32>
    %cst_20 = arith.constant 0.176776692 : f32
    %54 = vector.broadcast %cst_20 : f32 to vector<8x8xf32>
    %55 = arith.mulf %53, %54 : vector<8x8xf32>
    %cst_21 = arith.constant -1.000000e+30 : f32
    %56 = vector.broadcast %cst_21 : f32 to vector<8x8xf32>
    %57 = arith.select %11, %56, %55 : vector<8x8xi1>, vector<8x8xf32>
    %cst_22 = arith.constant dense<0xFF800000> : vector<8xf32>
    %58 = vector.multi_reduction <maximumf>, %57, %cst_22 [1] : vector<8x8xf32> to vector<8xf32>
    %59 = vector.shape_cast %58 : vector<8xf32> to vector<8x1xf32>
    %60 = vector.broadcast %59 : vector<8x1xf32> to vector<8x8xf32>
    %61 = arith.subf %57, %60 : vector<8x8xf32>
    %62 = math.exp %61 : vector<8x8xf32>
    %cst_23 = arith.constant dense<0.000000e+00> : vector<8xf32>
    %63 = vector.multi_reduction <add>, %62, %cst_23 [1] : vector<8x8xf32> to vector<8xf32>
    %64 = vector.shape_cast %63 : vector<8xf32> to vector<8x1xf32>
    %65 = tpu.reciprocal %64 {approx = true} : vector<8x1xf32> -> vector<8x1xf32>
    %66 = vector.broadcast %65 : vector<8x1xf32> to vector<8x8xf32>
    %67 = arith.mulf %62, %66 : vector<8x8xf32>
    %cst_24 = arith.constant dense<0.000000e+00> : vector<8x8xf32>
    %68 = tpu.matmul %67, %52, %cst_24 {dimension_numbers = #tpu.dot_dimension_numbers<[1], [0], [0], [1], [0, 0, 1, 1], [], []>} : vector<8x8xf32>, vector<8x8xf32>, vector<8x8xf32> -> vector<8x8xf32>
    %69 = vector.extract_strided_slice %1 {offsets = [0, 24], sizes = [8, 8], strides = [1, 1]} : vector<8x32xf32> to vector<8x8xf32>
    %70 = vector.extract_strided_slice %3 {offsets = [0, 24], sizes = [8, 8], strides = [1, 1]} : vector<8x32xf32> to vector<8x8xf32>
    %71 = vector.extract_strided_slice %5 {offsets = [0, 24], sizes = [8, 8], strides = [1, 1]} : vector<8x32xf32> to vector<8x8xf32>
    %cst_25 = arith.constant dense<0.000000e+00> : vector<8x8xf32>
    %72 = tpu.matmul %69, %70, %cst_25 {dimension_numbers = #tpu.dot_dimension_numbers<[1], [1], [0], [0], [0, 0, 1, 0], [], []>} : vector<8x8xf32>, vector<8x8xf32>, vector<8x8xf32> -> vector<8x8xf32>
    %cst_26 = arith.constant 0.176776692 : f32
    %73 = vector.broadcast %cst_26 : f32 to vector<8x8xf32>
    %74 = arith.mulf %72, %73 : vector<8x8xf32>
    %cst_27 = arith.constant -1.000000e+30 : f32
    %75 = vector.broadcast %cst_27 : f32 to vector<8x8xf32>
    %76 = arith.select %11, %75, %74 : vector<8x8xi1>, vector<8x8xf32>
    %cst_28 = arith.constant dense<0xFF800000> : vector<8xf32>
    %77 = vector.multi_reduction <maximumf>, %76, %cst_28 [1] : vector<8x8xf32> to vector<8xf32>
    %78 = vector.shape_cast %77 : vector<8xf32> to vector<8x1xf32>
    %79 = vector.broadcast %78 : vector<8x1xf32> to vector<8x8xf32>
    %80 = arith.subf %76, %79 : vector<8x8xf32>
    %81 = math.exp %80 : vector<8x8xf32>
    %cst_29 = arith.constant dense<0.000000e+00> : vector<8xf32>
    %82 = vector.multi_reduction <add>, %81, %cst_29 [1] : vector<8x8xf32> to vector<8xf32>
    %83 = vector.shape_cast %82 : vector<8xf32> to vector<8x1xf32>
    %84 = tpu.reciprocal %83 {approx = true} : vector<8x1xf32> -> vector<8x1xf32>
    %85 = vector.broadcast %84 : vector<8x1xf32> to vector<8x8xf32>
    %86 = arith.mulf %81, %85 : vector<8x8xf32>
    %cst_30 = arith.constant dense<0.000000e+00> : vector<8x8xf32>
    %87 = tpu.matmul %86, %71, %cst_30 {dimension_numbers = #tpu.dot_dimension_numbers<[1], [0], [0], [1], [0, 0, 1, 1], [], []>} : vector<8x8xf32>, vector<8x8xf32>, vector<8x8xf32> -> vector<8x8xf32>
    %88 = tpu.concatenate %30, %49, %68, %87 in 1 : vector<8x8xf32>, vector<8x8xf32>, vector<8x8xf32>, vector<8x8xf32> -> vector<8x32xf32>
    %c0_31 = arith.constant 0 : index
    %c0_32 = arith.constant 0 : index
    %c0_33 = arith.constant 0 : index
    %89 = vector.load %arg4[%c0_31, %c0_32, %c0_33] : memref<1x8x32xf32, #tpu.memory_space<vmem>>, vector<1x8x32xf32>
    %90 = vector.shape_cast %89 : vector<1x8x32xf32> to vector<8x32xf32>
    %91 = vector.shape_cast %88 : vector<8x32xf32> to vector<1x8x32xf32>
    tpu.vector_store %arg4[%c0_31, %c0_32, %c0_33], %91 {strides = array<i32>} : memref<1x8x32xf32, #tpu.memory_space<vmem>>, vector<1x8x32xf32>,
    return
  }
  func.func @transform_0(%arg0: i32) -> (i32, i32, i32) {
    %c0_i32 = arith.constant 0 : i32
    %c0_i32_0 = arith.constant 0 : i32
    %c0_i32_1 = arith.constant 0 : i32
    return %arg0, %c0_i32, %c0_i32_0 : i32, i32, i32
  }
  func.func @transform_1(%arg0: i32) -> (i32, i32, i32) {
    %c0_i32 = arith.constant 0 : i32
    %c0_i32_0 = arith.constant 0 : i32
    %c0_i32_1 = arith.constant 0 : i32
    return %arg0, %c0_i32, %c0_i32_0 : i32, i32, i32
  }
  func.func @transform_2(%arg0: i32) -> (i32, i32, i32) {
    %c0_i32 = arith.constant 0 : i32
    %c0_i32_0 = arith.constant 0 : i32
    %c0_i32_1 = arith.constant 0 : i32
    return %arg0, %c0_i32, %c0_i32_0 : i32, i32, i32
  }
  func.func @transform_3(%arg0: i32) -> (i32, i32, i32) {
    %c0_i32 = arith.constant 0 : i32
    %c0_i32_0 = arith.constant 0 : i32
    %c0_i32_1 = arith.constant 0 : i32
    return %arg0, %c0_i32, %c0_i32_0 : i32, i32, i32
  }
}

</mosaic_0001>

<bundles_post_ra>
// kernel: transformer_forward.42
= control target key start
LH: loop header
LB: loop body
LE: loop exit
PB: predicated region body
PF: predicated region fallthrough
CT: control target
= control target key end

     0   :  { %vm21_vm0 = vcmask 261120   ;;  %s154_s1 = inlined_call_operand.vmem [shape: f32[16,32], index: 1, kind: input, shape index: {}]   ;;  %s155_s2 = inlined_call_operand.vmem [shape: f32[1,32], index: 2, kind: input, shape index: {}]   ;;  %s156_s0 = inlined_call_operand.vmem [shape: f32[16,32], index: 0, kind: input, shape index: {}]   ;;  %s157_s3 = inlined_call_operand.vmem [shape: f32[1,32], index: 3, kind: input, shape index: {}]   ;;  %s158_s4 = inlined_call_operand.vmem [shape: f32[16,32], index: 4, kind: output, shape index: {}]  }
   0x1   :  { %v19_v0 = vld [vmem:[%s154_s1] sm:$0xff]  ;;  %v20_v1 = vld [vmem:[%s154_s1 + $0x8] sm:$0xff] }
   0x2   :  { %v22_v2 = vsel %vm21_vm0, %v19_v0, 0.0  ;;  %v25_v3 = vsel %vm21_vm0, %v20_v1, 0.0  ;;  %v89_v30 = vld [vmem:[%s155_s2] ss:$0 sm:$0xff]  ;;  %v18_v39 = vld [vmem:[%s156_s0 + $0x8] sm:$0xff] }
   0x3   :  { %23 = vadd.xlane.f32.xlu0 %v22_v2  ;;  %v17_v33 = vld [vmem:[%s156_s0] sm:$0xff] }
   0x4   :  { %v90_v35 = vld [vmem:[%s157_s3] ss:$0 sm:$0xff] }
   0x7   :  { %26 = vadd.xlane.f32.xlu0 %v25_v3 }
  0x90   :  { %v24_v4 = vpop.xlane.xlu0 %23 }
  0x91   :  { %v29_v5 = vmul.f32 0.03125, %v24_v4 }
  0x93   :  { %v31_v6 = vsub.f32 %v19_v0, %v29_v5 }
  0x94   :  { %v27_v7 = vpop.xlane.xlu0 %26 }
  0x95   :  { %v30_v8 = vmul.f32 0.03125, %v27_v7  ;;  %v33_v9 = vmul.f32 %v31_v6, %v31_v6  ;;  %v68_v31 = vmul.f32 %v89_v30, %v31_v6 }
  0x97   :  { %v32_v10 = vsub.f32 %v20_v1, %v30_v8  ;;  %v35_v11 = vsel %vm21_vm0, %v33_v9, 0.0 }
  0x98   :  { %36 = vadd.xlane.f32.xlu1 %v35_v11 }
  0x99   :  { %v34_v12 = vmul.f32 %v32_v10, %v32_v10  ;;  %v69_v36 = vmul.f32 %v89_v30, %v32_v10 }
  0x9b   :  { %v38_v13 = vsel %vm21_vm0, %v34_v12, 0.0 }
  0x9c   :  { %39 = vadd.xlane.f32.xlu1 %v38_v13 }
 0x125   :  { %v37_v14 = vpop.xlane.xlu1 %36 }
 0x126   :  { %v41_v15 = vmul.f32 0.032258064, %v37_v14 }
 0x128   :  { %91 = vrsqrt.f32 %v41_v15  ;;  %vm45_vm1 = vcmp.eq.f32.partialorder %v41_v15, inf  ;;  %v48_v20 = vand.u32 2147483648, %v41_v15  ;;  %vm47_vm2 = vcmp.eq.f32.partialorder %v41_v15, 0.0 }
 0x129   :  { %v40_v16 = vpop.xlane.xlu1 %39 }
 0x12a   :  { %v42_v17 = vmul.f32 0.032258064, %v40_v16 }
 0x12c   :  { %93 = vrsqrt.f32 %v42_v17  ;;  %vm52_vm3 = vcmp.eq.f32.partialorder %v42_v17, inf  ;;  %v55_v26 = vand.u32 2147483648, %v42_v17  ;;  %vm54_vm4 = vcmp.eq.f32.partialorder %v42_v17, 0.0 }
 0x132   :  { %v92_v18 = vpop.eup %91 }
 0x133   :  { %v44_v19 = vmul.f32 %v92_v18, %v41_v15 }
 0x135   :  { %v46_v21 = vsel %vm45_vm1, %v41_v15, %v44_v19 }
 0x136   :  { %v94_v22 = vpop.eup %93  ;;  %v49_v23 = vsel %vm47_vm2, %v48_v20, %v46_v21 }
 0x137   :  { %v57_v24 = vadd.f32 1e-06, %v49_v23  ;;  %v51_v25 = vmul.f32 %v94_v22, %v42_v17 }
 0x139   :  { %95 = vrcp.f32 %v57_v24  ;;  %v53_v27 = vsel %vm52_vm3, %v42_v17, %v51_v25 }
 0x13a   :  { %v56_v28 = vsel %vm54_vm4, %v55_v26, %v53_v27 }
 0x13b   :  { %v58_v29 = vadd.f32 1e-06, %v56_v28 }
 0x13d   :  { %97 = vrcp.f32 %v58_v29 }
 0x143   :  { %v96_v32 = vpop.eup %95 }
 0x144   :  { %v70_v34 = vmul.f32 %v96_v32, %v68_v31 }
 0x146   :  { %v72_v37 = vadd.f32 %v70_v34, %v17_v33 }
 0x147   :  { %v98_v38 = vpop.eup %97 }
 0x148   :  { %v81_v40 = vadd.f32 %v90_v35, %v72_v37  ;;  %v71_v41 = vmul.f32 %v98_v38, %v69_v36 }
 0x14a   :  { %83 = vst.msk [vmem:[%s158_s4] sm:$0xff] %vm21_vm0, %v81_v40  ;;  %v73_v42 = vadd.f32 %v71_v41, %v18_v39 }
 0x14c   :  { %v82_v43 = vadd.f32 %v90_v35, %v73_v42 }
 0x14e   :  { %84 = vst.msk [vmem:[%s158_s4 + $0x8] sm:$0xff] %vm21_vm0, %v82_v43 }

// kernel: transformer_forward.39
= control target key start
LH: loop header
LB: loop body
LE: loop exit
PB: predicated region body
PF: predicated region fallthrough
CT: control target
= control target key end

     0   :  { %s308_s1 = inlined_call_operand.vmem [shape: f32[128,128], index: 1, kind: input, shape index: {}]   ;;  %s309_s0 = inlined_call_operand.vmem [shape: f32[16,128], index: 0, kind: input, shape index: {}]   ;;  %s310_s2 = inlined_call_operand.vmem [shape: f32[1,128], index: 2, kind: input, shape index: {}]   ;;  %s311_s3 = inlined_call_operand.vmem [shape: f32[16,128], index: 3, kind: output, shape index: {}]  }
   0x1   :  { %v24_v0 = vld [vmem:[%s308_s1] sm:$0xff]  ;;  %v25_v1 = vld [vmem:[%s308_s1 + $0x8] sm:$0xff]  ;;  %v26_v2 = vld [vmem:[%s308_s1 + $0x10] sm:$0xff] }
   0x2   :  { %v193_v3 = vpack.c.bf16 %v25_v1, %v24_v0  ;;  %v27_v4 = vld [vmem:[%s308_s1 + $0x18] sm:$0xff]  ;;  %v28_v6 = vld [vmem:[%s308_s1 + $0x20] sm:$0xff]  ;;  %v29_v7 = vld [vmem:[%s308_s1 + $0x28] sm:$0xff] }
   0x3   :  { %v197_v5 = vpack.c.bf16 %v27_v4, %v26_v2  ;;  %v201_v8 = vpack.c.bf16 %v29_v7, %v28_v6  ;;  %v22_v9 = vld [vmem:[%s309_s0] sm:$0xff]  ;;  %v30_v10 = vld [vmem:[%s308_s1 + $0x30] sm:$0xff]  ;;  %v31_v11 = vld [vmem:[%s308_s1 + $0x38] sm:$0xff] }
   0x4   :  { %194 = vmatprep.subr.bf16.mxu0 %v193_v3  ;;  %190 = vmatprep.mubr.f32.mxu0 %v22_v9  ;;  %v205_v12 = vpack.c.bf16 %v31_v11, %v30_v10  ;;  %v32_v13 = vld [vmem:[%s308_s1 + $0x40] sm:$0xff]  ;;  %v33_v14 = vld [vmem:[%s308_s1 + $0x48] sm:$0xff]  ;;  %v34_v16 = vld [vmem:[%s308_s1 + $0x50] sm:$0xff] }
   0x5   :  { %196 = vmatpush3.bf16.msra.mxu0 %v193_v3  ;;  %v209_v15 = vpack.c.bf16 %v33_v14, %v32_v13  ;;  %v35_v17 = vld [vmem:[%s308_s1 + $0x58] sm:$0xff]  ;;  %v36_v19 = vld [vmem:[%s308_s1 + $0x60] sm:$0xff]  ;;  %v37_v20 = vld [vmem:[%s308_s1 + $0x68] sm:$0xff] }
   0x6   :  { %198 = vmatprep.subr.bf16.mxu0 %v197_v5  ;;  %v213_v18 = vpack.c.bf16 %v35_v17, %v34_v16  ;;  %v217_v21 = vpack.c.bf16 %v37_v20, %v36_v19  ;;  %v38_v22 = vld [vmem:[%s308_s1 + $0x70] sm:$0xff]  ;;  %v39_v23 = vld [vmem:[%s308_s1 + $0x78] sm:$0xff]  ;;  %v23_v25 = vld [vmem:[%s309_s0 + $0x8] sm:$0xff] }
   0x7   :  { %v221_v24 = vpack.c.bf16 %v39_v23, %v38_v22  ;;  %v139_v26 = vld [vmem:[%s310_s2] ss:$0 sm:$0xff] }
   0x9   :  { %200 = vmatpush3.bf16.msra.mxu0 %v197_v5 }
   0xa   :  { %202 = vmatprep.subr.bf16.mxu0 %v201_v8 }
   0xd   :  { %204 = vmatpush3.bf16.msra.mxu0 %v201_v8 }
   0xe   :  { %206 = vmatprep.subr.bf16.mxu0 %v205_v12 }
  0x11   :  { %208 = vmatpush3.bf16.msra.mxu0 %v205_v12 }
  0x12   :  { %210 = vmatprep.subr.bf16.mxu0 %v209_v15 }
  0x15   :  { %212 = vmatpush3.bf16.msra.mxu0 %v209_v15 }
  0x16   :  { %214 = vmatprep.subr.bf16.mxu0 %v213_v18 }
  0x19   :  { %216 = vmatpush3.bf16.msra.mxu0 %v213_v18 }
  0x1a   :  { %218 = vmatprep.subr.bf16.mxu0 %v217_v21 }
  0x1d   :  { %220 = vmatpush3.bf16.msra.mxu0 %v217_v21 }
  0x1e   :  { %222 = vmatprep.subr.bf16.mxu0 %v221_v24 }
  0x21   :  { %224 = vmatpush3.bf16.msra.mxu0 %v221_v24 }
  0x24   :  { %191 = vmatmul.mubr.f32.vlgmr.msra.gmra.mrb[0].mxu0 %v23_v25 }
  0xf7   :  { %v192_v27 = vpop.f32.mrb[0].mxu0 }
  0xf8   :  { %v132_v28 = vadd.f32 %v192_v27, %v139_v26  ;;  %v106_v29 = vpop.f32.mrb[1].mxu0 }
  0xf9   :  { %v131_v30 = vadd.f32 %v139_v26, %v106_v29 }
  0xfa   :  { %134 = vst [vmem:[%s311_s3 + $0x8] sm:$0xff] %v132_v28 }
  0xfb   :  { %133 = vst [vmem:[%s311_s3] sm:$0xff] %v131_v30 }

// kernel: transformer_forward.43
= control target key start
LH: loop header
LB: loop body
LE: loop exit
PB: predicated region body
PF: predicated region fallthrough
CT: control target
= control target key end

     0   :  { %s310_s1 = inlined_call_operand.vmem [shape: f32[128,128], index: 1, kind: input, shape index: {}]   ;;  %s311_s0 = inlined_call_operand.vmem [shape: f32[16,128], index: 0, kind: input, shape index: {}]   ;;  %s312_s2 = inlined_call_operand.vmem [shape: f32[1,128], index: 2, kind: input, shape index: {}]   ;;  %s313_s3 = inlined_call_operand.vmem [shape: f32[16,128], index: 3, kind: output, shape index: {}]  }
   0x1   :  { %v24_v0 = vld [vmem:[%s310_s1] sm:$0xff]  ;;  %v25_v1 = vld [vmem:[%s310_s1 + $0x8] sm:$0xff]  ;;  %v26_v2 = vld [vmem:[%s310_s1 + $0x10] sm:$0xff] }
   0x2   :  { %v195_v3 = vpack.c.bf16 %v25_v1, %v24_v0  ;;  %v27_v4 = vld [vmem:[%s310_s1 + $0x18] sm:$0xff]  ;;  %v28_v6 = vld [vmem:[%s310_s1 + $0x20] sm:$0xff]  ;;  %v29_v7 = vld [vmem:[%s310_s1 + $0x28] sm:$0xff] }
   0x3   :  { %v199_v5 = vpack.c.bf16 %v27_v4, %v26_v2  ;;  %v203_v8 = vpack.c.bf16 %v29_v7, %v28_v6  ;;  %v22_v9 = vld [vmem:[%s311_s0] sm:$0xff]  ;;  %v30_v10 = vld [vmem:[%s310_s1 + $0x30] sm:$0xff]  ;;  %v31_v11 = vld [vmem:[%s310_s1 + $0x38] sm:$0xff] }
   0x4   :  { %196 = vmatprep.subr.bf16.mxu0 %v195_v3  ;;  %192 = vmatprep.mubr.f32.mxu0 %v22_v9  ;;  %v207_v12 = vpack.c.bf16 %v31_v11, %v30_v10  ;;  %v32_v13 = vld [vmem:[%s310_s1 + $0x40] sm:$0xff]  ;;  %v33_v14 = vld [vmem:[%s310_s1 + $0x48] sm:$0xff]  ;;  %v34_v16 = vld [vmem:[%s310_s1 + $0x50] sm:$0xff] }
   0x5   :  { %198 = vmatpush3.bf16.msra.mxu0 %v195_v3  ;;  %v211_v15 = vpack.c.bf16 %v33_v14, %v32_v13  ;;  %v35_v17 = vld [vmem:[%s310_s1 + $0x58] sm:$0xff]  ;;  %v36_v19 = vld [vmem:[%s310_s1 + $0x60] sm:$0xff]  ;;  %v37_v20 = vld [vmem:[%s310_s1 + $0x68] sm:$0xff] }
   0x6   :  { %200 = vmatprep.subr.bf16.mxu0 %v199_v5  ;;  %v215_v18 = vpack.c.bf16 %v35_v17, %v34_v16  ;;  %v219_v21 = vpack.c.bf16 %v37_v20, %v36_v19  ;;  %v38_v22 = vld [vmem:[%s310_s1 + $0x70] sm:$0xff]  ;;  %v39_v23 = vld [vmem:[%s310_s1 + $0x78] sm:$0xff]  ;;  %v23_v25 = vld [vmem:[%s311_s0 + $0x8] sm:$0xff] }
   0x7   :  { %v223_v24 = vpack.c.bf16 %v39_v23, %v38_v22  ;;  %v141_v26 = vld [vmem:[%s312_s2] ss:$0 sm:$0xff] }
   0x9   :  { %202 = vmatpush3.bf16.msra.mxu0 %v199_v5 }
   0xa   :  { %204 = vmatprep.subr.bf16.mxu0 %v203_v8 }
   0xd   :  { %206 = vmatpush3.bf16.msra.mxu0 %v203_v8 }
   0xe   :  { %208 = vmatprep.subr.bf16.mxu0 %v207_v12 }
  0x11   :  { %210 = vmatpush3.bf16.msra.mxu0 %v207_v12 }
  0x12   :  { %212 = vmatprep.subr.bf16.mxu0 %v211_v15 }
  0x15   :  { %214 = vmatpush3.bf16.msra.mxu0 %v211_v15 }
  0x16   :  { %216 = vmatprep.subr.bf16.mxu0 %v215_v18 }
  0x19   :  { %218 = vmatpush3.bf16.msra.mxu0 %v215_v18 }
  0x1a   :  { %220 = vmatprep.subr.bf16.mxu0 %v219_v21 }
  0x1d   :  { %222 = vmatpush3.bf16.msra.mxu0 %v219_v21 }
  0x1e   :  { %224 = vmatprep.subr.bf16.mxu0 %v223_v24 }
  0x21   :  { %226 = vmatpush3.bf16.msra.mxu0 %v223_v24 }
  0x24   :  { %193 = vmatmul.mubr.f32.vlgmr.msra.gmra.mrb[0].mxu0 %v23_v25 }
  0xf7   :  { %v194_v27 = vpop.f32.mrb[0].mxu0 }
  0xf8   :  { %v132_v28 = vadd.f32 %v194_v27, %v141_v26  ;;  %v106_v29 = vpop.f32.mrb[1].mxu0 }
  0xf9   :  { %v131_v30 = vadd.f32 %v141_v26, %v106_v29 }
  0xfa   :  { %v134_v31 = vmax.f32 %v132_v28, 0.0 }
  0xfb   :  { %v133_v32 = vmax.f32 %v131_v30, 0.0 }
  0xfc   :  { %136 = vst [vmem:[%s313_s3 + $0x8] sm:$0xff] %v134_v31 }
  0xfd   :  { %135 = vst [vmem:[%s313_s3] sm:$0xff] %v133_v32 }

// kernel: transformer_forward.40
= control target key start
LH: loop header
LB: loop body
LE: loop exit
PB: predicated region body
PF: predicated region fallthrough
CT: control target
= control target key end

     0   :  { %s1114_s12 = smov 0   ;;  %s1217_s0 = inlined_call_operand.vmem [shape: f32[2,8,32], index: 0, kind: input, shape index: {}]   ;;  %s1218_s1 = inlined_call_operand.vmem [shape: f32[2,8,32], index: 1, kind: input, shape index: {}]   ;;  %s1219_s2 = inlined_call_operand.vmem [shape: f32[2,8,32], index: 2, kind: input, shape index: {}]   ;;  %s1220_s3 = inlined_call_operand.vmem [shape: f32[2,8,32], index: 3, kind: output, shape index: {}]  }
   0x1 LB: > { %s967_s13 = sadd.s32 4294967295, %s1084_s12   ;;  %p971_p0 = scmp.ge.s32.totalorder %s1084_s12, 1  ;;  %s1084_s12 = sphi %s1114_s12, %s13_s12  }
   0x2   : > { %p154_p1 = scmp.lt.s32.totalorder %s1084_s12, 3 }
   0x4   : > { %p155_p2 = pnand %p971_p0, %p154_p1 }
   0x5   : > { %p184_p3 = scmp.lt.s32.totalorder (!%p155_p2), %s967_s13, 1  ;;  %v1086_v0 = vmov (!%p155_p2), 0.0   ;;  %vm1087_vm0 = vmmov (!%p155_p2), 0   ;;  %vm206_vm1 = vcmask (!%p155_p2), 64512   ;;  %v203_v3 = vlaneseq (!%p155_p2)  ;;  %s1088_s21 = smov (!%p155_p2), 120  }
   0x6   : > { %158 = sbr.rel (%p155_p2) target bundleno = 1464 (0x5b8), region = 32  ;;  %1006 = vmatprep.subr.mxu0 (!%p155_p2), %v1086_v0  ;;  %1008 = vmatprep.mubr.msk.f32.mxu0 (!%p155_p2), %vm1087_vm0, %v1086_v0  ;;  %s1089_s22 = smov (!%p155_p2), 112   ;;  %vm884_vm3 = vcmask (!%p155_p2), 130048   ;;  %vm886_vm4 = vcmask (!%p155_p2), 195584   ;;  %vm888_vm5 = vcmask (!%p155_p2), 261120  }
   0x7   : > { %1011 = vmatprep.subr.mxu1 (!%p155_p2), %v1086_v0  ;;  %1013 = vmatprep.mubr.msk.f32.mxu1 (!%p155_p2), %vm1087_vm0, %v1086_v0  ;;  %v1143_v4 = vand.u32 (!%p155_p2), 127, %v203_v3  ;;  %s1090_s23 = smov (!%p155_p2), 104   ;;  %s1091_s27 = smov (!%p155_p2), 8  }
   0x8   : > { %s1092_s28 = smov (!%p155_p2), 16   ;;  %s1093_s29 = smov (!%p155_p2), 24  }
   0x9   : > { %vm205_vm2 = vcmp.ge.s32.totalorder (!%p155_p2), %v1143_v4, 8 }
   0xd   : > { %s1222_s13 = smov (!%p184_p3, %s967_s13), 1 }
   0xe   : > { %s1128_s14 = sshll.u32 %s1222_s13, 3 }
   0xf   : > { %s191_s17 = scalar_lea.vmem %s1218_s1, %s1128_s14  ;;  %s187_s20 = scalar_lea.vmem %s1217_s0, %s1128_s14 }
  0x10   : > { %v201_v1 = vld [vmem:[%s191_s17] sm:$0xff]  ;;  %s195_s26 = scalar_lea.vmem %s1219_s2, %s1128_s14  ;;  %s199_s5 = scalar_lea.vmem %s1220_s3, %s1128_s14 }
  0x11   : > { %1007 = vmatpush3.xpose.msk.msra.mxu0 %vm206_vm1, %v201_v1  ;;  %v200_v2 = vld [vmem:[%s187_s20] sm:$0xff]  ;;  %371 = vrot.lane.b32.xlu1 %v201_v1, %s1088_s21 }
  0x12   : > { %1021 = vmatprep.subr.mxu0 %v1086_v0  ;;  %v1159_v15 = vld [vmem:[%s195_s26] sm:$0xff] }
  0x13   : > { %1012 = vmatpush3.msra.mxu1 %v1159_v15 }
  0x14   : > { %1009 = vmatmul.mubr.msk.f32.vlgmr.msra.gmra.mrb[0].mxu0 %vm206_vm1, %v200_v2  ;;  %1016 = vmatprep.subr.mxu1 %v1086_v0 }
  0x15   : > { %1023 = vmatprep.mubr.msk.f32.mxu0 %vm1087_vm0, %v1086_v0  ;;  %369 = vrot.lane.b32.xlu1 %v200_v2, %s1088_s21 }
  0x19   : > { %537 = vrot.lane.b32.xlu1 %v200_v2, %s1089_s22 }
  0x1d   : > { %706 = vrot.lane.b32.xlu1 %v201_v1, %s1090_s23 }
  0x21   : > { %704 = vrot.lane.b32.xlu1 %v200_v2, %s1090_s23 }
  0x83   : > { %v372_v16 = vpop.permute.xlu1 %371 }
  0x87   : > { %v370_v18 = vpop.permute.xlu1 %369 }
  0x8b   : > { %v538_v20 = vpop.permute.xlu1 %537 }
  0x8f   : > { %v707_v23 = vpop.permute.xlu1 %706 }
  0x93   : > { %v705_v24 = vpop.permute.xlu1 %704 }
  0xe7   : > { %v279_v5 = vpop.f32.mrb[0].mxu0 }
  0xe8   : > { %v283_v6 = vmul.f32 0.17677669, %v279_v5  ;;  %v1010_v7 = vpop.f32.mrb[1].mxu0 }
  0xea   : > { %v284_v8 = vsel %vm205_vm2, -1e+30, %v283_v6 }
  0xeb   : > { %v285_v9 = vsel %vm206_vm1, %v284_v8, -inf }
  0xec   : > { %286 = vmax.xlane.f32.xlu0 %v285_v9 }
 0x179   : > { %v287_v10 = vpop.xlane.xlu0 %286 }
 0x17a   : > { %v288_v11 = vsub.f32 %v284_v8, %v287_v10 }
 0x17c   : > { %v289_v12 = vmul.f32 1.442695, %v288_v11 }
 0x17e   : > { %1062 = vpow2.f32 %v289_v12 }
 0x188   : > { %v1063_v13 = vpop.eup %1062 }
 0x189   : > { %v291_v14 = vsel %vm206_vm1, %v1063_v13, 0.0 }
 0x18a   : > { %292 = vadd.xlane.f32.xlu0 %v291_v14 }
 0x1a0   : > { %539 = vrot.lane.b32.xlu0 %v201_v1, %s1089_s22 }
 0x217   : > { %v293_v17 = vpop.xlane.xlu0 %292 }
 0x218   : > { %1064 = vrcp.f32 %v293_v17 }
 0x21b   : > { %v540_v22 = vpop.permute.xlu0 %539 }
 0x222   : > { %v1065_v19 = vpop.eup %1064 }
 0x223   : > { %v295_v21 = vmul.f32 %v1065_v19, %v1063_v13 }
 0x225   : > { %1014 = vmatmul.mubr.msk.f32.vlgmr.msra.gmra.mrb[0].mxu1 %vm206_vm1, %v295_v21 }
 0x226   : > { %1017 = vmatpush3.xpose.msk.msra.mxu1 %vm206_vm1, %v372_v16  ;;  %1018 = vmatprep.mubr.msk.f32.mxu1 %vm1087_vm0, %v1086_v0 }
 0x227   : > { %1026 = vmatprep.subr.mxu1 %v1086_v0 }
 0x229   : > { %1019 = vmatmul.mubr.msk.f32.vlgmr.msra.gmra.mrb[2].mxu1 %vm206_vm1, %v370_v18 }
 0x22a   : > { %1027 = vmatpush3.xpose.msk.msra.mxu1 %vm206_vm1, %v540_v22  ;;  %1028 = vmatprep.mubr.msk.f32.mxu1 %vm1087_vm0, %v1086_v0 }
 0x22b   : > { %1036 = vmatprep.subr.mxu1 %v1086_v0 }
 0x22d   : > { %1029 = vmatmul.mubr.msk.f32.vlgmr.msra.gmra.mrb[4].mxu1 %vm206_vm1, %v538_v20 }
 0x22e   : > { %1037 = vmatpush3.xpose.msk.msra.mxu1 %vm206_vm1, %v707_v23  ;;  %1038 = vmatprep.mubr.msk.f32.mxu1 %vm1087_vm0, %v1086_v0 }
 0x231   : > { %1039 = vmatmul.mubr.msk.f32.vlgmr.msra.gmra.mrb[6].mxu1 %vm206_vm1, %v705_v24 }
 0x2f8   : > { %v1179_v25 = vpop.f32.mrb[0].mxu1 }
 0x2f9   : > { %v1015_v26 = vpop.f32.mrb[1].mxu1 }
 0x2fc   : > { %v443_v27 = vpop.f32.mrb[2].mxu1 }
 0x2fd   : > { %v447_v28 = vmul.f32 0.17677669, %v443_v27  ;;  %v1020_v29 = vpop.f32.mrb[3].mxu1 }
 0x2ff   : > { %v448_v30 = vsel %vm205_vm2, -1e+30, %v447_v28 }
 0x300   : > { %v611_v31 = vpop.f32.mrb[4].mxu1  ;;  %v449_v32 = vsel %vm206_vm1, %v448_v30, -inf }
 0x301   : > { %v615_v33 = vmul.f32 0.17677669, %v611_v31  ;;  %450 = vmax.xlane.f32.xlu1 %v449_v32  ;;  %v1030_v34 = vpop.f32.mrb[5].mxu1 }
 0x303   : > { %v616_v35 = vsel %vm205_vm2, -1e+30, %v615_v33 }
 0x304   : > { %v778_v36 = vpop.f32.mrb[6].mxu1  ;;  %v617_v37 = vsel %vm206_vm1, %v616_v35, -inf }
 0x305   : > { %v782_v38 = vmul.f32 0.17677669, %v778_v36  ;;  %618 = vmax.xlane.f32.xlu0 %v617_v37  ;;  %v1040_v39 = vpop.f32.mrb[7].mxu1 }
 0x307   : > { %v783_v40 = vsel %vm205_vm2, -1e+30, %v782_v38 }
 0x308   : > { %v784_v41 = vsel %vm206_vm1, %v783_v40, -inf }
 0x309   : > { %785 = vmax.xlane.f32.xlu1 %v784_v41 }
 0x38e   : > { %v451_v42 = vpop.xlane.xlu1 %450 }
 0x38f   : > { %v452_v43 = vsub.f32 %v448_v30, %v451_v42 }
 0x391   : > { %v453_v44 = vmul.f32 1.442695, %v452_v43 }
 0x392   : > { %v619_v45 = vpop.xlane.xlu0 %618 }
 0x393   : > { %1066 = vpow2.f32 %v453_v44  ;;  %v620_v46 = vsub.f32 %v616_v35, %v619_v45 }
 0x395   : > { %v621_v47 = vmul.f32 1.442695, %v620_v46 }
 0x396   : > { %v786_v52 = vpop.xlane.xlu1 %785 }
 0x397   : > { %1068 = vpow2.f32 %v621_v47  ;;  %v787_v53 = vsub.f32 %v783_v40, %v786_v52 }
 0x399   : > { %v788_v54 = vmul.f32 1.442695, %v787_v53 }
 0x39b   : > { %1070 = vpow2.f32 %v788_v54 }
 0x39d   : > { %v1067_v48 = vpop.eup %1066 }
 0x39e   : > { %v455_v49 = vsel %vm206_vm1, %v1067_v48, 0.0 }
 0x39f   : > { %456 = vadd.xlane.f32.xlu1 %v455_v49 }
 0x3a1   : > { %v1069_v50 = vpop.eup %1068 }
 0x3a2   : > { %v623_v51 = vsel %vm206_vm1, %v1069_v50, 0.0 }
 0x3a3   : > { %624 = vadd.xlane.f32.xlu0 %v623_v51 }
 0x3a5   : > { %v1071_v55 = vpop.eup %1070 }
 0x3a6   : > { %v790_v56 = vsel %vm206_vm1, %v1071_v55, 0.0 }
 0x3b0   : > { %628 = vrot.lane.b32.xlu1 %v1159_v15, %s1089_s22 }
 0x3b9   : > { %461 = vrot.lane.b32.xlu0 %v1159_v15, %s1088_s21 }
 0x3d4   : > { %791 = vadd.xlane.f32.xlu1 %v790_v56 }
 0x3e5   : > { %795 = vrot.lane.b32.xlu1 %v1159_v15, %s1090_s23 }
 0x42c   : > { %v457_v57 = vpop.xlane.xlu1 %456 }
 0x42d   : > { %1072 = vrcp.f32 %v457_v57 }
 0x430   : > { %v625_v58 = vpop.xlane.xlu0 %624  ;;  %v629_v62 = vpop.permute.xlu1 %628 }
 0x431   : > { %1074 = vrcp.f32 %v625_v58 }
 0x434   : > { %v462_v59 = vpop.permute.xlu0 %461 }
 0x435   : > { %1022 = vmatpush3.msra.mxu0 %v462_v59 }
 0x436   : > { %1031 = vmatprep.subr.mxu0 %v1086_v0 }
 0x437   : > { %v1073_v60 = vpop.eup %1072 }
 0x438   : > { %v459_v61 = vmul.f32 %v1073_v60, %v1067_v48 }
 0x43a   : > { %1024 = vmatmul.mubr.msk.f32.vlgmr.msra.gmra.mrb[2].mxu0 %vm206_vm1, %v459_v61 }
 0x43b   : > { %v1075_v63 = vpop.eup %1074  ;;  %1032 = vmatpush3.msra.mxu0 %v629_v62  ;;  %1033 = vmatprep.mubr.msk.f32.mxu0 %vm1087_vm0, %v1086_v0 }
 0x43c   : > { %v627_v1 = vmul.f32 %v1075_v63, %v1069_v50  ;;  %1041 = vmatprep.subr.mxu0 %v1086_v0 }
 0x43e   : > { %1034 = vmatmul.mubr.msk.f32.vlgmr.msra.gmra.mrb[4].mxu0 %vm206_vm1, %v627_v1 }
 0x43f   : > { %1043 = vmatprep.mubr.msk.f32.mxu0 %vm1087_vm0, %v1086_v0 }
 0x461   : > { %v792_v2 = vpop.xlane.xlu1 %791 }
 0x462   : > { %1076 = vrcp.f32 %v792_v2 }
 0x465   : > { %v796_v3 = vpop.permute.xlu1 %795 }
 0x466   : > { %1042 = vmatpush3.msra.mxu0 %v796_v3 }
 0x46c   : > { %v1077_v4 = vpop.eup %1076 }
 0x46d   : > { %v794_v5 = vmul.f32 %v1077_v4, %v1071_v55 }
 0x46f   : > { %1044 = vmatmul.mubr.msk.f32.vlgmr.msra.gmra.mrb[6].mxu0 %vm206_vm1, %v794_v5 }
 0x50d   : > { %v533_v6 = vpop.f32.mrb[2].mxu0 }
 0x50e   : > { %872 = vrot.lane.b32.xlu0 %v533_v6, %s1091_s27  ;;  %v1025_v7 = vpop.f32.mrb[3].mxu0 }
 0x511   : > { %v700_v8 = vpop.f32.mrb[4].mxu0 }
 0x512   : > { %876 = vrot.lane.b32.xlu1 %v700_v8, %s1092_s28  ;;  %v1035_v9 = vpop.f32.mrb[5].mxu0 }
 0x542   : > { %v867_v10 = vpop.f32.mrb[6].mxu0 }
 0x543   : > { %880 = vrot.lane.b32.xlu0 %v867_v10, %s1093_s29  ;;  %v1045_v0 = vpop.f32.mrb[7].mxu0 }
 0x580   : > { %v873_v11 = vpop.permute.xlu0 %872 }
 0x581   : > { %v883_v13 = vsel %vm206_vm1, %v1179_v25, %v873_v11 }
 0x584   : > { %v877_v12 = vpop.permute.xlu1 %876 }
 0x585   : > { %v885_v14 = vsel %vm884_vm3, %v883_v13, %v877_v12 }
 0x5b5   : > { %v881_v15 = vpop.permute.xlu0 %880 }
 0x5b6   : > { %v887_v16 = vsel %vm886_vm4, %v885_v14, %v881_v15 }
 0x5b7   : > { %889 = vst.msk [vmem:[%s199_s5] sm:$0xff] %vm888_vm5, %v887_v16 }
 0x5b8 PF: > { %s13_s12 = sadd.s32 1, %s1084_s12  }
 0x5b9   : > { %p10_p4 = scmp.ge.s32.totalorder %s13_s12, 4  }
 0x5bb   :  { %12 = sbr.rel (!%p10_p4) target bundleno = 1 (0x1), region = 68 }

// kernel: transformer_forward.54
= control target key start
LH: loop header
LB: loop body
LE: loop exit
PB: predicated region body
PF: predicated region fallthrough
CT: control target
= control target key end

     0   :  { %s1118_s12 = smov 0   ;;  %s1222_s0 = inlined_call_operand.vmem [shape: f32[2,8,32], index: 0, kind: input, shape index: {}]   ;;  %s1223_s1 = inlined_call_operand.vmem [shape: f32[2,8,32], index: 1, kind: input, shape index: {}]   ;;  %s1224_s2 = inlined_call_operand.vmem [shape: f32[2,8,32], index: 2, kind: input, shape index: {}]   ;;  %s1225_s3 = inlined_call_operand.vmem [shape: f32[2,8,32], index: 3, kind: output, shape index: {}]  }
   0x1 LB: > { %s971_s13 = sadd.s32 4294967295, %s1088_s12   ;;  %p975_p0 = scmp.ge.s32.totalorder %s1088_s12, 1  ;;  %s1088_s12 = sphi %s1118_s12, %s13_s12  }
   0x2   : > { %p154_p1 = scmp.lt.s32.totalorder %s1088_s12, 3 }
   0x4   : > { %p155_p2 = pnand %p975_p0, %p154_p1 }
   0x5   : > { %p184_p3 = scmp.lt.s32.totalorder (!%p155_p2), %s971_s13, 1  ;;  %v1090_v0 = vmov (!%p155_p2), 0.0   ;;  %vm1091_vm0 = vmmov (!%p155_p2), 0   ;;  %vm210_vm1 = vcmask (!%p155_p2), 64512   ;;  %v203_v3 = vlaneseq (!%p155_p2)  ;;  %s1092_s21 = smov (!%p155_p2), 120  }
   0x6   : > { %158 = sbr.rel (%p155_p2) target bundleno = 1464 (0x5b8), region = 32  ;;  %1010 = vmatprep.subr.mxu0 (!%p155_p2), %v1090_v0  ;;  %1012 = vmatprep.mubr.msk.f32.mxu0 (!%p155_p2), %vm1091_vm0, %v1090_v0  ;;  %s1093_s22 = smov (!%p155_p2), 112   ;;  %vm888_vm5 = vcmask (!%p155_p2), 130048   ;;  %vm890_vm6 = vcmask (!%p155_p2), 195584   ;;  %vm892_vm7 = vcmask (!%p155_p2), 261120  }
   0x7   : > { %1015 = vmatprep.subr.mxu1 (!%p155_p2), %v1090_v0  ;;  %1017 = vmatprep.mubr.msk.f32.mxu1 (!%p155_p2), %vm1091_vm0, %v1090_v0  ;;  %v204_v4 = vand.u32 (!%p155_p2), 127, %v203_v3  ;;  %v207_v5 = vshrl.u32 (!%p155_p2), %v203_v3, 7  ;;  %s1094_s23 = smov (!%p155_p2), 104   ;;  %s1095_s27 = smov (!%p155_p2), 8  }
   0x8   : > { %s1096_s28 = smov (!%p155_p2), 16   ;;  %s1097_s29 = smov (!%p155_p2), 24  }
   0x9   : > { %vm205_vm2 = vcmp.ge.s32.totalorder (!%p155_p2), %v204_v4, 8  ;;  %vm208_vm3 = vcmp.gt.s32.totalorder (!%p155_p2), %v204_v4, %v207_v5 }
   0xa   : > { %vm1147_vm4 = vmor (!%p155_p2), %vm205_vm2, %vm208_vm3 }
   0xd   : > { %s1229_s13 = smov (!%p184_p3, %s971_s13), 1 }
   0xe   : > { %s1132_s14 = sshll.u32 %s1229_s13, 3 }
   0xf   : > { %s191_s17 = scalar_lea.vmem %s1223_s1, %s1132_s14  ;;  %s187_s20 = scalar_lea.vmem %s1222_s0, %s1132_s14 }
  0x10   : > { %v201_v1 = vld [vmem:[%s191_s17] sm:$0xff]  ;;  %s195_s26 = scalar_lea.vmem %s1224_s2, %s1132_s14  ;;  %s199_s5 = scalar_lea.vmem %s1225_s3, %s1132_s14 }
  0x11   : > { %1011 = vmatpush3.xpose.msk.msra.mxu0 %vm210_vm1, %v201_v1  ;;  %v200_v2 = vld [vmem:[%s187_s20] sm:$0xff]  ;;  %375 = vrot.lane.b32.xlu1 %v201_v1, %s1092_s21 }
  0x12   : > { %1025 = vmatprep.subr.mxu0 %v1090_v0  ;;  %v1164_v17 = vld [vmem:[%s195_s26] sm:$0xff] }
  0x13   : > { %1016 = vmatpush3.msra.mxu1 %v1164_v17 }
  0x14   : > { %1013 = vmatmul.mubr.msk.f32.vlgmr.msra.gmra.mrb[0].mxu0 %vm210_vm1, %v200_v2  ;;  %1020 = vmatprep.subr.mxu1 %v1090_v0 }
  0x15   : > { %1027 = vmatprep.mubr.msk.f32.mxu0 %vm1091_vm0, %v1090_v0  ;;  %373 = vrot.lane.b32.xlu1 %v200_v2, %s1092_s21 }
  0x19   : > { %541 = vrot.lane.b32.xlu1 %v200_v2, %s1093_s22 }
  0x1d   : > { %710 = vrot.lane.b32.xlu1 %v201_v1, %s1094_s23 }
  0x21   : > { %708 = vrot.lane.b32.xlu1 %v200_v2, %s1094_s23 }
  0x83   : > { %v376_v18 = vpop.permute.xlu1 %375 }
  0x87   : > { %v374_v20 = vpop.permute.xlu1 %373 }
  0x8b   : > { %v542_v22 = vpop.permute.xlu1 %541 }
  0x8f   : > { %v711_v25 = vpop.permute.xlu1 %710 }
  0x93   : > { %v709_v26 = vpop.permute.xlu1 %708 }
  0xe7   : > { %v283_v6 = vpop.f32.mrb[0].mxu0 }
  0xe8   : > { %v287_v8 = vmul.f32 0.17677669, %v283_v6  ;;  %v1014_v9 = vpop.f32.mrb[1].mxu0 }
  0xea   : > { %v288_v10 = vsel %vm1147_vm4, -1e+30, %v287_v8 }
  0xeb   : > { %v289_v11 = vsel %vm210_vm1, %v288_v10, -inf }
  0xec   : > { %290 = vmax.xlane.f32.xlu0 %v289_v11 }
 0x179   : > { %v291_v12 = vpop.xlane.xlu0 %290 }
 0x17a   : > { %v292_v13 = vsub.f32 %v288_v10, %v291_v12 }
 0x17c   : > { %v293_v14 = vmul.f32 1.442695, %v292_v13 }
 0x17e   : > { %1066 = vpow2.f32 %v293_v14 }
 0x188   : > { %v1067_v15 = vpop.eup %1066 }
 0x189   : > { %v295_v16 = vsel %vm210_vm1, %v1067_v15, 0.0 }
 0x18a   : > { %296 = vadd.xlane.f32.xlu0 %v295_v16 }
 0x1a0   : > { %543 = vrot.lane.b32.xlu0 %v201_v1, %s1093_s22 }
 0x217   : > { %v297_v19 = vpop.xlane.xlu0 %296 }
 0x218   : > { %1068 = vrcp.f32 %v297_v19 }
 0x21b   : > { %v544_v24 = vpop.permute.xlu0 %543 }
 0x222   : > { %v1069_v21 = vpop.eup %1068 }
 0x223   : > { %v299_v23 = vmul.f32 %v1069_v21, %v1067_v15 }
 0x225   : > { %1018 = vmatmul.mubr.msk.f32.vlgmr.msra.gmra.mrb[0].mxu1 %vm210_vm1, %v299_v23 }
 0x226   : > { %1021 = vmatpush3.xpose.msk.msra.mxu1 %vm210_vm1, %v376_v18  ;;  %1022 = vmatprep.mubr.msk.f32.mxu1 %vm1091_vm0, %v1090_v0 }
 0x227   : > { %1030 = vmatprep.subr.mxu1 %v1090_v0 }
 0x229   : > { %1023 = vmatmul.mubr.msk.f32.vlgmr.msra.gmra.mrb[2].mxu1 %vm210_vm1, %v374_v20 }
 0x22a   : > { %1031 = vmatpush3.xpose.msk.msra.mxu1 %vm210_vm1, %v544_v24  ;;  %1032 = vmatprep.mubr.msk.f32.mxu1 %vm1091_vm0, %v1090_v0 }
 0x22b   : > { %1040 = vmatprep.subr.mxu1 %v1090_v0 }
 0x22d   : > { %1033 = vmatmul.mubr.msk.f32.vlgmr.msra.gmra.mrb[4].mxu1 %vm210_vm1, %v542_v22 }
 0x22e   : > { %1041 = vmatpush3.xpose.msk.msra.mxu1 %vm210_vm1, %v711_v25  ;;  %1042 = vmatprep.mubr.msk.f32.mxu1 %vm1091_vm0, %v1090_v0 }
 0x231   : > { %1043 = vmatmul.mubr.msk.f32.vlgmr.msra.gmra.mrb[6].mxu1 %vm210_vm1, %v709_v26 }
 0x2f8   : > { %v1184_v27 = vpop.f32.mrb[0].mxu1 }
 0x2f9   : > { %v1019_v28 = vpop.f32.mrb[1].mxu1 }
 0x2fc   : > { %v447_v29 = vpop.f32.mrb[2].mxu1 }
 0x2fd   : > { %v451_v30 = vmul.f32 0.17677669, %v447_v29  ;;  %v1024_v31 = vpop.f32.mrb[3].mxu1 }
 0x2ff   : > { %v452_v32 = vsel %vm1147_vm4, -1e+30, %v451_v30 }
 0x300   : > { %v615_v33 = vpop.f32.mrb[4].mxu1  ;;  %v453_v34 = vsel %vm210_vm1, %v452_v32, -inf }
 0x301   : > { %v619_v35 = vmul.f32 0.17677669, %v615_v33  ;;  %454 = vmax.xlane.f32.xlu1 %v453_v34  ;;  %v1034_v36 = vpop.f32.mrb[5].mxu1 }
 0x303   : > { %v620_v37 = vsel %vm1147_vm4, -1e+30, %v619_v35 }
 0x304   : > { %v782_v38 = vpop.f32.mrb[6].mxu1  ;;  %v621_v39 = vsel %vm210_vm1, %v620_v37, -inf }
 0x305   : > { %v786_v40 = vmul.f32 0.17677669, %v782_v38  ;;  %622 = vmax.xlane.f32.xlu0 %v621_v39  ;;  %v1044_v41 = vpop.f32.mrb[7].mxu1 }
 0x307   : > { %v787_v42 = vsel %vm1147_vm4, -1e+30, %v786_v40 }
 0x308   : > { %v788_v43 = vsel %vm210_vm1, %v787_v42, -inf }
 0x309   : > { %789 = vmax.xlane.f32.xlu1 %v788_v43 }
 0x38e   : > { %v455_v44 = vpop.xlane.xlu1 %454 }
 0x38f   : > { %v456_v45 = vsub.f32 %v452_v32, %v455_v44 }
 0x391   : > { %v457_v46 = vmul.f32 1.442695, %v456_v45 }
 0x392   : > { %v623_v47 = vpop.xlane.xlu0 %622 }
 0x393   : > { %1070 = vpow2.f32 %v457_v46  ;;  %v624_v48 = vsub.f32 %v620_v37, %v623_v47 }
 0x395   : > { %v625_v49 = vmul.f32 1.442695, %v624_v48 }
 0x396   : > { %v790_v54 = vpop.xlane.xlu1 %789 }
 0x397   : > { %1072 = vpow2.f32 %v625_v49  ;;  %v791_v55 = vsub.f32 %v787_v42, %v790_v54 }
 0x399   : > { %v792_v56 = vmul.f32 1.442695, %v791_v55 }
 0x39b   : > { %1074 = vpow2.f32 %v792_v56 }
 0x39d   : > { %v1071_v50 = vpop.eup %1070 }
 0x39e   : > { %v459_v51 = vsel %vm210_vm1, %v1071_v50, 0.0 }
 0x39f   : > { %460 = vadd.xlane.f32.xlu1 %v459_v51 }
 0x3a1   : > { %v1073_v52 = vpop.eup %1072 }
 0x3a2   : > { %v627_v53 = vsel %vm210_vm1, %v1073_v52, 0.0 }
 0x3a3   : > { %628 = vadd.xlane.f32.xlu0 %v627_v53 }
 0x3a5   : > { %v1075_v57 = vpop.eup %1074 }
 0x3a6   : > { %v794_v58 = vsel %vm210_vm1, %v1075_v57, 0.0 }
 0x3b0   : > { %632 = vrot.lane.b32.xlu1 %v1164_v17, %s1093_s22 }
 0x3b9   : > { %465 = vrot.lane.b32.xlu0 %v1164_v17, %s1092_s21 }
 0x3d4   : > { %795 = vadd.xlane.f32.xlu1 %v794_v58 }
 0x3e5   : > { %799 = vrot.lane.b32.xlu1 %v1164_v17, %s1094_s23 }
 0x42c   : > { %v461_v59 = vpop.xlane.xlu1 %460 }
 0x42d   : > { %1076 = vrcp.f32 %v461_v59 }
 0x430   : > { %v629_v60 = vpop.xlane.xlu0 %628  ;;  %v633_v1 = vpop.permute.xlu1 %632 }
 0x431   : > { %1078 = vrcp.f32 %v629_v60 }
 0x434   : > { %v466_v61 = vpop.permute.xlu0 %465 }
 0x435   : > { %1026 = vmatpush3.msra.mxu0 %v466_v61 }
 0x436   : > { %1035 = vmatprep.subr.mxu0 %v1090_v0 }
 0x437   : > { %v1077_v62 = vpop.eup %1076 }
 0x438   : > { %v463_v63 = vmul.f32 %v1077_v62, %v1071_v50 }
 0x43a   : > { %1028 = vmatmul.mubr.msk.f32.vlgmr.msra.gmra.mrb[2].mxu0 %vm210_vm1, %v463_v63 }
 0x43b   : > { %v1079_v2 = vpop.eup %1078  ;;  %1036 = vmatpush3.msra.mxu0 %v633_v1  ;;  %1037 = vmatprep.mubr.msk.f32.mxu0 %vm1091_vm0, %v1090_v0 }
 0x43c   : > { %v631_v3 = vmul.f32 %v1079_v2, %v1073_v52  ;;  %1045 = vmatprep.subr.mxu0 %v1090_v0 }
 0x43e   : > { %1038 = vmatmul.mubr.msk.f32.vlgmr.msra.gmra.mrb[4].mxu0 %vm210_vm1, %v631_v3 }
 0x43f   : > { %1047 = vmatprep.mubr.msk.f32.mxu0 %vm1091_vm0, %v1090_v0 }
 0x461   : > { %v796_v4 = vpop.xlane.xlu1 %795 }
 0x462   : > { %1080 = vrcp.f32 %v796_v4 }
 0x465   : > { %v800_v5 = vpop.permute.xlu1 %799 }
 0x466   : > { %1046 = vmatpush3.msra.mxu0 %v800_v5 }
 0x46c   : > { %v1081_v6 = vpop.eup %1080 }
 0x46d   : > { %v798_v7 = vmul.f32 %v1081_v6, %v1075_v57 }
 0x46f   : > { %1048 = vmatmul.mubr.msk.f32.vlgmr.msra.gmra.mrb[6].mxu0 %vm210_vm1, %v798_v7 }
 0x50d   : > { %v537_v8 = vpop.f32.mrb[2].mxu0 }
 0x50e   : > { %876 = vrot.lane.b32.xlu0 %v537_v8, %s1095_s27  ;;  %v1029_v9 = vpop.f32.mrb[3].mxu0 }
 0x511   : > { %v704_v10 = vpop.f32.mrb[4].mxu0 }
 0x512   : > { %880 = vrot.lane.b32.xlu1 %v704_v10, %s1096_s28  ;;  %v1039_v11 = vpop.f32.mrb[5].mxu0 }
 0x542   : > { %v871_v12 = vpop.f32.mrb[6].mxu0 }
 0x543   : > { %884 = vrot.lane.b32.xlu0 %v871_v12, %s1097_s29  ;;  %v1049_v0 = vpop.f32.mrb[7].mxu0 }
 0x580   : > { %v877_v13 = vpop.permute.xlu0 %876 }
 0x581   : > { %v887_v15 = vsel %vm210_vm1, %v1184_v27, %v877_v13 }
 0x584   : > { %v881_v14 = vpop.permute.xlu1 %880 }
 0x585   : > { %v889_v16 = vsel %vm888_vm5, %v887_v15, %v881_v14 }
 0x5b5   : > { %v885_v17 = vpop.permute.xlu0 %884 }
 0x5b6   : > { %v891_v18 = vsel %vm890_vm6, %v889_v16, %v885_v17 }
 0x5b7   : > { %893 = vst.msk [vmem:[%s199_s5] sm:$0xff] %vm892_vm7, %v891_v18 }
 0x5b8 PF: > { %s13_s12 = sadd.s32 1, %s1088_s12  }
 0x5b9   : > { %p10_p4 = scmp.ge.s32.totalorder %s13_s12, 4  }
 0x5bb   :  { %12 = sbr.rel (!%p10_p4) target bundleno = 1 (0x1), region = 68 }

</bundles_post_ra>
